<compile_context>
chip_gen: v7x
topology: tpu7x:2x2x1
jax: 0.10.0
libtpu: 0.0.40
codegen_flags: <defaults>
</compile_context>

<pallas_src>
import functools

import jax
import jax.numpy as jnp
from jax.experimental import pallas as pl
from jax.experimental.pallas import tpu as pltpu

# ---- synthetic (small) hyper-parameters consistent with the module ----
LATENT_DIM = 16
IMG_SHAPE = (1, 8, 8)                                   # (C, H, W)
IMG_DIM = IMG_SHAPE[0] * IMG_SHAPE[1] * IMG_SHAPE[2]    # 64
IMG_DIM_PAD = 128                                       # lane-dense final layer
HIDDEN = (128, 256, 512, 1024)                          # fixed by the module definition
BN_EPS = 0.8                                            # nn.BatchNorm1d(out_feat, 0.8)
LEAK = 0.2

# packed-vector layout (all offsets are multiples of 128 -> lane-aligned slices)
OFF_B1 = 0
OFF_G2 = OFF_B1 + HIDDEN[0]        # 128
OFF_BE2 = OFF_G2 + HIDDEN[1]       # 384
OFF_G3 = OFF_BE2 + HIDDEN[1]       # 640
OFF_BE3 = OFF_G3 + HIDDEN[2]       # 1152
OFF_G4 = OFF_BE3 + HIDDEN[2]       # 1664
OFF_BE4 = OFF_G4 + HIDDEN[3]       # 2688
OFF_B5 = OFF_BE4 + HIDDEN[3]       # 3712
VEC_TOTAL = OFF_B5 + IMG_DIM_PAD   # 3840


def _leaky_relu(x):
    return jnp.where(x > 0, x, LEAK * x)


def _bn_leaky_relu(x, gamma, beta):
    # Training-mode BatchNorm1d: one-pass batch moments, gamma folded into the scale.
    inv_b = 1.0 / x.shape[0]
    mean = jnp.sum(x, axis=0, keepdims=True) * inv_b
    mean_sq = jnp.sum(x * x, axis=0, keepdims=True) * inv_b
    var = mean_sq - mean * mean        # biased batch variance (eps=0.8 swamps cancellation)
    scale = gamma * jax.lax.rsqrt(var + BN_EPS)
    y = x * scale + (beta - mean * scale)
    return _leaky_relu(y)


def generator_kernel(
    z_ref,        # (GROUP, LATENT_DIM) f32   blocked per grid step
    vec_ref,      # (1, VEC_TOTAL)  f32  packed b1|g2|be2|g3|be3|g4|be4|b5(padded), resident
    w1_ref,       # (LATENT_DIM, 128)   bf16  resident
    w2_ref,       # (128, 256)          bf16  resident
    w3_ref,       # (256, 512)          bf16  resident
    w4_ref,       # (512, 1024)         bf16  resident
    w5_ref,       # (1024, IMG_DIM_PAD) bf16  resident
    out_ref,      # (GROUP, IMG_DIM_PAD) f32  blocked per grid step
):
    b1 = vec_ref[:, OFF_B1:OFF_B1 + HIDDEN[0]]
    g2 = vec_ref[:, OFF_G2:OFF_G2 + HIDDEN[1]]
    be2 = vec_ref[:, OFF_BE2:OFF_BE2 + HIDDEN[1]]
    g3 = vec_ref[:, OFF_G3:OFF_G3 + HIDDEN[2]]
    be3 = vec_ref[:, OFF_BE3:OFF_BE3 + HIDDEN[2]]
    g4 = vec_ref[:, OFF_G4:OFF_G4 + HIDDEN[3]]
    be4 = vec_ref[:, OFF_BE4:OFF_BE4 + HIDDEN[3]]
    b5 = vec_ref[:, OFF_B5:OFF_B5 + IMG_DIM_PAD]

    # block(latent, 128, normalize=False): Linear + LeakyReLU
    z = z_ref[...].astype(jnp.bfloat16)
    h = jnp.dot(z, w1_ref[...], preferred_element_type=jnp.float32) + b1
    h = _leaky_relu(h)

    # block(128, 256): Linear + BN + LeakyReLU (Linear bias cancelled by BN mean sub)
    h = jnp.dot(h.astype(jnp.bfloat16), w2_ref[...], preferred_element_type=jnp.float32)
    h = _bn_leaky_relu(h, g2, be2)

    # block(256, 512)
    h = jnp.dot(h.astype(jnp.bfloat16), w3_ref[...], preferred_element_type=jnp.float32)
    h = _bn_leaky_relu(h, g3, be3)

    # block(512, 1024)
    h = jnp.dot(h.astype(jnp.bfloat16), w4_ref[...], preferred_element_type=jnp.float32)
    h = _bn_leaky_relu(h, g4, be4)

    # final Linear(1024, IMG_DIM padded to 128) + Tanh
    h = jnp.dot(h.astype(jnp.bfloat16), w5_ref[...], preferred_element_type=jnp.float32) + b5
    out_ref[...] = jnp.tanh(h)


def init_params(key):
    """PyTorch-style init: Linear W,b ~ U(-1/sqrt(in), 1/sqrt(in)); BN gamma=1, beta=0.
    Linear weights stored pre-transposed as (in, out) and cast to bfloat16.
    b2/b3/b4 are omitted: train-mode BN cancels a per-feature bias exactly."""
    dims = (LATENT_DIM,) + HIDDEN + (IMG_DIM,)
    weights, biases = [], []
    for i in range(len(dims) - 1):
        fan_in, fan_out = dims[i], dims[i + 1]
        key, kw, kb = jax.random.split(key, 3)
        bound = 1.0 / float(fan_in) ** 0.5
        weights.append(jax.random.uniform(kw, (fan_in, fan_out), jnp.float32, -bound, bound))
        biases.append(jax.random.uniform(kb, (1, fan_out), jnp.float32, -bound, bound))

    w1, w2, w3, w4, w5 = weights
    b1, _, _, _, b5 = biases        # b2/b3/b4 have no effect under train-mode BN

    # pad the final layer to 128 output features (lane-dense matmul + store)
    w5 = jnp.pad(w5, ((0, 0), (0, IMG_DIM_PAD - IMG_DIM)))
    b5 = jnp.pad(b5, ((0, 0), (0, IMG_DIM_PAD - IMG_DIM)))

    # pack all small per-feature vectors into one lane-aligned operand (1 DMA)
    ones = lambda n: jnp.ones((n,), jnp.float32)
    zeros = lambda n: jnp.zeros((n,), jnp.float32)
    vec = jnp.concatenate([
        b1.reshape(-1),
        ones(HIDDEN[1]), zeros(HIDDEN[1]),   # gamma2, beta2
        ones(HIDDEN[2]), zeros(HIDDEN[2]),   # gamma3, beta3
        ones(HIDDEN[3]), zeros(HIDDEN[3]),   # gamma4, beta4
        b5.reshape(-1),
    ]).reshape(1, VEC_TOTAL)

    bf16 = lambda w: w.astype(jnp.bfloat16)
    return (vec, bf16(w1), bf16(w2), bf16(w3), bf16(w4), bf16(w5))


@functools.partial(jax.jit, static_argnames=("group_size",))
def generator_forward(z, params, *, group_size=None):
    """Fused generator forward.

    z: (B, LATENT_DIM).  B must be a multiple of `group_size` (default: B).
    Each consecutive group of `group_size` rows is an independent forward pass of
    the module (its own train-mode BatchNorm statistics); all groups share one
    pallas_call so the weights are streamed from HBM exactly once.
    """
    vec, w1, w2, w3, w4, w5 = params
    B = z.shape[0]
    if group_size is None:
        group_size = B
    assert B % group_size == 0, (B, group_size)
    assert group_size % 8 == 0, "group_size must be a multiple of 8 (sublane tiling)"
    num_groups = B // group_size

    # Weights / packed vector: constant index_map -> fetched once, VMEM-resident
    # across all grid steps (and per-core on v7x megacore).
    def resident(shape):
        return pl.BlockSpec(shape, lambda g: (0, 0))

    img_flat = pl.pallas_call(
        generator_kernel,
        out_shape=jax.ShapeDtypeStruct((B, IMG_DIM_PAD), jnp.float32),
        grid=(num_groups,),
        in_specs=[
            pl.BlockSpec((group_size, LATENT_DIM), lambda g: (g, 0)),   # z: per group
            resident((1, VEC_TOTAL)),
            resident((LATENT_DIM, HIDDEN[0])),
            resident((HIDDEN[0], HIDDEN[1])),
            resident((HIDDEN[1], HIDDEN[2])),
            resident((HIDDEN[2], HIDDEN[3])),
            resident((HIDDEN[3], IMG_DIM_PAD)),
        ],
        out_specs=pl.BlockSpec((group_size, IMG_DIM_PAD), lambda g: (g, 0)),
        compiler_params=pltpu.CompilerParams(
            dimension_semantics=("parallel",),   # v7x: shard groups across both TCs
            vmem_limit_bytes=16 << 20,
        ),
    )(z, vec, w1, w2, w3, w4, w5)
    # slice off the lane padding and reshape to NCHW (glue, outside the kernel)
    return img_flat[:, :IMG_DIM].reshape(B, *IMG_SHAPE)


def _reference_forward(z, params, group_size):
    """Pure-JAX reference (same bf16 weights, f32 math, two-pass BN) for a sanity check."""
    vec, w1, w2, w3, w4, w5 = params
    vec = vec.reshape(-1)
    b1 = vec[OFF_B1:OFF_B1 + HIDDEN[0]]
    b5 = vec[OFF_B5:OFF_B5 + IMG_DIM_PAD]

    def bn_lrelu(x):
        mean = jnp.mean(x, axis=0, keepdims=True)
        var = jnp.mean((x - mean) ** 2, axis=0, keepdims=True)
        y = (x - mean) * jax.lax.rsqrt(var + BN_EPS)
        return jnp.where(y > 0, y, LEAK * y)

    def one_group(zg):
        h = zg @ w1.astype(jnp.float32) + b1
        h = jnp.where(h > 0, h, LEAK * h)
        h = bn_lrelu(h @ w2.astype(jnp.float32))
        h = bn_lrelu(h @ w3.astype(jnp.float32))
        h = bn_lrelu(h @ w4.astype(jnp.float32))
        h = jnp.tanh(h @ w5.astype(jnp.float32) + b5)
        return h

    B = z.shape[0]
    zg = z.reshape(B // group_size, group_size, LATENT_DIM)
    out = jax.vmap(one_group)(zg).reshape(B, IMG_DIM_PAD)
    return out[:, :IMG_DIM].reshape(B, *IMG_SHAPE)


if __name__ == "__main__":
    key = jax.random.PRNGKey(0)
    key, kz = jax.random.split(key)

    GROUP = 8          # each group of 8 samples is one independent module forward
    NUM_GROUPS = 4     # amortize the weight stream across 4 groups in one pallas_call
    B = GROUP * NUM_GROUPS

    z = jax.random.normal(kz, (B, LATENT_DIM), jnp.float32)
    params = init_params(key)

    img = generator_forward(z, params, group_size=GROUP)
    jax.block_until_ready(img)

    assert img.shape == (B, *IMG_SHAPE), img.shape
    assert img.dtype == jnp.float32

    # light correctness check against a pure-JAX reference (same bf16 weights;
    # generous tolerance for one-pass vs two-pass BN moments / accumulation order)
    ref = _reference_forward(z, params, GROUP)
    assert jnp.max(jnp.abs(img - ref)) < 2e-2, float(jnp.max(jnp.abs(img - ref)))

    print("KERNEL_OK")
</pallas_src>

<mosaic_0001>
module attributes {stable_mosaic.version = 11 : i64} {
  func.func @generator_kernel(%arg0: i32, %arg1: memref<8x16xf32, #tpu.memory_space<vmem>>, %arg2: memref<1x3840xf32, #tpu.memory_space<vmem>>, %arg3: memref<16x128xbf16, #tpu.memory_space<vmem>>, %arg4: memref<128x256xbf16, #tpu.memory_space<vmem>>, %arg5: memref<256x512xbf16, #tpu.memory_space<vmem>>, %arg6: memref<512x1024xbf16, #tpu.memory_space<vmem>>, %arg7: memref<1024x128xbf16, #tpu.memory_space<vmem>>, %arg8: memref<8x128xf32, #tpu.memory_space<vmem>>) attributes {dimension_semantics = [#tpu.dimension_semantics<parallel>], iteration_bounds = array<i64: 4>, scalar_prefetch = 0 : i64, scratch_operands = 0 : i64, tpu.core_type = #tpu.core_type<tc>, window_params = [{transform_indices = @transform_0, window_bounds = array<i64: 8, 16>}, {pipeline_mode = #tpu.pipeline_mode<synchronous>, transform_indices = @transform_1, window_bounds = array<i64: 1, 3840>}, {pipeline_mode = #tpu.pipeline_mode<synchronous>, transform_indices = @transform_2, window_bounds = array<i64: 16, 128>}, {pipeline_mode = #tpu.pipeline_mode<synchronous>, transform_indices = @transform_3, window_bounds = array<i64: 128, 256>}, {pipeline_mode = #tpu.pipeline_mode<synchronous>, transform_indices = @transform_4, window_bounds = array<i64: 256, 512>}, {pipeline_mode = #tpu.pipeline_mode<synchronous>, transform_indices = @transform_5, window_bounds = array<i64: 512, 1024>}, {pipeline_mode = #tpu.pipeline_mode<synchronous>, transform_indices = @transform_6, window_bounds = array<i64: 1024, 128>}, {transform_indices = @transform_7, window_bounds = array<i64: 8, 128>}]} {
    %c0 = arith.constant 0 : index
    %c0_0 = arith.constant 0 : index
    %0 = vector.load %arg2[%c0, %c0_0] : memref<1x3840xf32, #tpu.memory_space<vmem>>, vector<1x128xf32>
    %c0_1 = arith.constant 0 : index
    %c128 = arith.constant 128 : index
    %1 = vector.load %arg2[%c0_1, %c128] : memref<1x3840xf32, #tpu.memory_space<vmem>>, vector<1x256xf32>
    %c0_2 = arith.constant 0 : index
    %c384 = arith.constant 384 : index
    %2 = vector.load %arg2[%c0_2, %c384] : memref<1x3840xf32, #tpu.memory_space<vmem>>, vector<1x256xf32>
    %c0_3 = arith.constant 0 : index
    %c640 = arith.constant 640 : index
    %3 = vector.load %arg2[%c0_3, %c640] : memref<1x3840xf32, #tpu.memory_space<vmem>>, vector<1x512xf32>
    %c0_4 = arith.constant 0 : index
    %c1152 = arith.constant 1152 : index
    %4 = vector.load %arg2[%c0_4, %c1152] : memref<1x3840xf32, #tpu.memory_space<vmem>>, vector<1x512xf32>
    %c0_5 = arith.constant 0 : index
    %c1664 = arith.constant 1664 : index
    %5 = vector.load %arg2[%c0_5, %c1664] : memref<1x3840xf32, #tpu.memory_space<vmem>>, vector<1x1024xf32>
    %c0_6 = arith.constant 0 : index
    %c2688 = arith.constant 2688 : index
    %6 = vector.load %arg2[%c0_6, %c2688] : memref<1x3840xf32, #tpu.memory_space<vmem>>, vector<1x1024xf32>
    %c0_7 = arith.constant 0 : index
    %c3712 = arith.constant 3712 : index
    %7 = vector.load %arg2[%c0_7, %c3712] : memref<1x3840xf32, #tpu.memory_space<vmem>>, vector<1x128xf32>
    %c0_8 = arith.constant 0 : index
    %c0_9 = arith.constant 0 : index
    %8 = vector.load %arg1[%c0_8, %c0_9] : memref<8x16xf32, #tpu.memory_space<vmem>>, vector<8x16xf32>
    %9 = arith.truncf %8 : vector<8x16xf32> to vector<8x16xbf16>
    %c0_10 = arith.constant 0 : index
    %c0_11 = arith.constant 0 : index
    %10 = vector.load %arg3[%c0_10, %c0_11] : memref<16x128xbf16, #tpu.memory_space<vmem>>, vector<16x128xbf16>
    %cst = arith.constant dense<0.000000e+00> : vector<8x128xf32>
    %11 = tpu.matmul %9, %10, %cst {dimension_numbers = #tpu.dot_dimension_numbers<[1], [0], [0], [1], [0, 0, 1, 1], [], []>} : vector<8x16xbf16>, vector<16x128xbf16>, vector<8x128xf32> -> vector<8x128xf32>
    %12 = vector.broadcast %0 : vector<1x128xf32> to vector<8x128xf32>
    %13 = arith.addf %11, %12 : vector<8x128xf32>
    %cst_12 = arith.constant 0.000000e+00 : f32
    %14 = vector.broadcast %cst_12 : f32 to vector<8x128xf32>
    %15 = arith.cmpf ogt, %13, %14 : vector<8x128xf32>
    %cst_13 = arith.constant 2.000000e-01 : f32
    %16 = vector.broadcast %cst_13 : f32 to vector<8x128xf32>
    %17 = arith.mulf %16, %13 : vector<8x128xf32>
    %18 = arith.select %15, %13, %17 : vector<8x128xi1>, vector<8x128xf32>
    %19 = arith.truncf %18 : vector<8x128xf32> to vector<8x128xbf16>
    %c0_14 = arith.constant 0 : index
    %c0_15 = arith.constant 0 : index
    %20 = vector.load %arg4[%c0_14, %c0_15] : memref<128x256xbf16, #tpu.memory_space<vmem>>, vector<128x256xbf16>
    %cst_16 = arith.constant dense<0.000000e+00> : vector<8x256xf32>
    %21 = tpu.matmul %19, %20, %cst_16 {dimension_numbers = #tpu.dot_dimension_numbers<[1], [0], [0], [1], [0, 0, 1, 1], [], []>} : vector<8x128xbf16>, vector<128x256xbf16>, vector<8x256xf32> -> vector<8x256xf32>
    %cst_17 = arith.constant dense<0.000000e+00> : vector<256xf32>
    %22 = vector.multi_reduction <add>, %21, %cst_17 [0] : vector<8x256xf32> to vector<256xf32>
    %23 = vector.shape_cast %22 : vector<256xf32> to vector<1x256xf32>
    %cst_18 = arith.constant 1.250000e-01 : f32
    %24 = vector.broadcast %cst_18 : f32 to vector<1x256xf32>
    %25 = arith.mulf %23, %24 : vector<1x256xf32>
    %26 = arith.mulf %21, %21 : vector<8x256xf32>
    %cst_19 = arith.constant dense<0.000000e+00> : vector<256xf32>
    %27 = vector.multi_reduction <add>, %26, %cst_19 [0] : vector<8x256xf32> to vector<256xf32>
    %28 = vector.shape_cast %27 : vector<256xf32> to vector<1x256xf32>
    %cst_20 = arith.constant 1.250000e-01 : f32
    %29 = vector.broadcast %cst_20 : f32 to vector<1x256xf32>
    %30 = arith.mulf %28, %29 : vector<1x256xf32>
    %31 = arith.mulf %25, %25 : vector<1x256xf32>
    %32 = arith.subf %30, %31 : vector<1x256xf32>
    %cst_21 = arith.constant 8.000000e-01 : f32
    %33 = vector.broadcast %cst_21 : f32 to vector<1x256xf32>
    %34 = arith.addf %32, %33 : vector<1x256xf32>
    %35 = math.rsqrt %34 : vector<1x256xf32>
    %36 = arith.mulf %1, %35 : vector<1x256xf32>
    %37 = vector.broadcast %36 : vector<1x256xf32> to vector<8x256xf32>
    %38 = arith.mulf %21, %37 : vector<8x256xf32>
    %39 = arith.mulf %25, %36 : vector<1x256xf32>
    %40 = arith.subf %2, %39 : vector<1x256xf32>
    %41 = vector.broadcast %40 : vector<1x256xf32> to vector<8x256xf32>
    %42 = arith.addf %38, %41 : vector<8x256xf32>
    %cst_22 = arith.constant 0.000000e+00 : f32
    %43 = vector.broadcast %cst_22 : f32 to vector<8x256xf32>
    %44 = arith.cmpf ogt, %42, %43 : vector<8x256xf32>
    %cst_23 = arith.constant 2.000000e-01 : f32
    %45 = vector.broadcast %cst_23 : f32 to vector<8x256xf32>
    %46 = arith.mulf %45, %42 : vector<8x256xf32>
    %47 = arith.select %44, %42, %46 : vector<8x256xi1>, vector<8x256xf32>
    %48 = arith.truncf %47 : vector<8x256xf32> to vector<8x256xbf16>
    %c0_24 = arith.constant 0 : index
    %c0_25 = arith.constant 0 : index
    %49 = vector.load %arg5[%c0_24, %c0_25] : memref<256x512xbf16, #tpu.memory_space<vmem>>, vector<256x512xbf16>
    %cst_26 = arith.constant dense<0.000000e+00> : vector<8x512xf32>
    %50 = tpu.matmul %48, %49, %cst_26 {dimension_numbers = #tpu.dot_dimension_numbers<[1], [0], [0], [1], [0, 0, 1, 1], [], []>} : vector<8x256xbf16>, vector<256x512xbf16>, vector<8x512xf32> -> vector<8x512xf32>
    %cst_27 = arith.constant dense<0.000000e+00> : vector<512xf32>
    %51 = vector.multi_reduction <add>, %50, %cst_27 [0] : vector<8x512xf32> to vector<512xf32>
    %52 = vector.shape_cast %51 : vector<512xf32> to vector<1x512xf32>
    %cst_28 = arith.constant 1.250000e-01 : f32
    %53 = vector.broadcast %cst_28 : f32 to vector<1x512xf32>
    %54 = arith.mulf %52, %53 : vector<1x512xf32>
    %55 = arith.mulf %50, %50 : vector<8x512xf32>
    %cst_29 = arith.constant dense<0.000000e+00> : vector<512xf32>
    %56 = vector.multi_reduction <add>, %55, %cst_29 [0] : vector<8x512xf32> to vector<512xf32>
    %57 = vector.shape_cast %56 : vector<512xf32> to vector<1x512xf32>
    %cst_30 = arith.constant 1.250000e-01 : f32
    %58 = vector.broadcast %cst_30 : f32 to vector<1x512xf32>
    %59 = arith.mulf %57, %58 : vector<1x512xf32>
    %60 = arith.mulf %54, %54 : vector<1x512xf32>
    %61 = arith.subf %59, %60 : vector<1x512xf32>
    %cst_31 = arith.constant 8.000000e-01 : f32
    %62 = vector.broadcast %cst_31 : f32 to vector<1x512xf32>
    %63 = arith.addf %61, %62 : vector<1x512xf32>
    %64 = math.rsqrt %63 : vector<1x512xf32>
    %65 = arith.mulf %3, %64 : vector<1x512xf32>
    %66 = vector.broadcast %65 : vector<1x512xf32> to vector<8x512xf32>
    %67 = arith.mulf %50, %66 : vector<8x512xf32>
    %68 = arith.mulf %54, %65 : vector<1x512xf32>
    %69 = arith.subf %4, %68 : vector<1x512xf32>
    %70 = vector.broadcast %69 : vector<1x512xf32> to vector<8x512xf32>
    %71 = arith.addf %67, %70 : vector<8x512xf32>
    %cst_32 = arith.constant 0.000000e+00 : f32
    %72 = vector.broadcast %cst_32 : f32 to vector<8x512xf32>
    %73 = arith.cmpf ogt, %71, %72 : vector<8x512xf32>
    %cst_33 = arith.constant 2.000000e-01 : f32
    %74 = vector.broadcast %cst_33 : f32 to vector<8x512xf32>
    %75 = arith.mulf %74, %71 : vector<8x512xf32>
    %76 = arith.select %73, %71, %75 : vector<8x512xi1>, vector<8x512xf32>
    %77 = arith.truncf %76 : vector<8x512xf32> to vector<8x512xbf16>
    %c0_34 = arith.constant 0 : index
    %c0_35 = arith.constant 0 : index
    %78 = vector.load %arg6[%c0_34, %c0_35] : memref<512x1024xbf16, #tpu.memory_space<vmem>>, vector<512x1024xbf16>
    %cst_36 = arith.constant dense<0.000000e+00> : vector<8x1024xf32>
    %79 = tpu.matmul %77, %78, %cst_36 {dimension_numbers = #tpu.dot_dimension_numbers<[1], [0], [0], [1], [0, 0, 1, 1], [], []>} : vector<8x512xbf16>, vector<512x1024xbf16>, vector<8x1024xf32> -> vector<8x1024xf32>
    %cst_37 = arith.constant dense<0.000000e+00> : vector<1024xf32>
    %80 = vector.multi_reduction <add>, %79, %cst_37 [0] : vector<8x1024xf32> to vector<1024xf32>
    %81 = vector.shape_cast %80 : vector<1024xf32> to vector<1x1024xf32>
    %cst_38 = arith.constant 1.250000e-01 : f32
    %82 = vector.broadcast %cst_38 : f32 to vector<1x1024xf32>
    %83 = arith.mulf %81, %82 : vector<1x1024xf32>
    %84 = arith.mulf %79, %79 : vector<8x1024xf32>
    %cst_39 = arith.constant dense<0.000000e+00> : vector<1024xf32>
    %85 = vector.multi_reduction <add>, %84, %cst_39 [0] : vector<8x1024xf32> to vector<1024xf32>
    %86 = vector.shape_cast %85 : vector<1024xf32> to vector<1x1024xf32>
    %cst_40 = arith.constant 1.250000e-01 : f32
    %87 = vector.broadcast %cst_40 : f32 to vector<1x1024xf32>
    %88 = arith.mulf %86, %87 : vector<1x1024xf32>
    %89 = arith.mulf %83, %83 : vector<1x1024xf32>
    %90 = arith.subf %88, %89 : vector<1x1024xf32>
    %cst_41 = arith.constant 8.000000e-01 : f32
    %91 = vector.broadcast %cst_41 : f32 to vector<1x1024xf32>
    %92 = arith.addf %90, %91 : vector<1x1024xf32>
    %93 = math.rsqrt %92 : vector<1x1024xf32>
    %94 = arith.mulf %5, %93 : vector<1x1024xf32>
    %95 = vector.broadcast %94 : vector<1x1024xf32> to vector<8x1024xf32>
    %96 = arith.mulf %79, %95 : vector<8x1024xf32>
    %97 = arith.mulf %83, %94 : vector<1x1024xf32>
    %98 = arith.subf %6, %97 : vector<1x1024xf32>
    %99 = vector.broadcast %98 : vector<1x1024xf32> to vector<8x1024xf32>
    %100 = arith.addf %96, %99 : vector<8x1024xf32>
    %cst_42 = arith.constant 0.000000e+00 : f32
    %101 = vector.broadcast %cst_42 : f32 to vector<8x1024xf32>
    %102 = arith.cmpf ogt, %100, %101 : vector<8x1024xf32>
    %cst_43 = arith.constant 2.000000e-01 : f32
    %103 = vector.broadcast %cst_43 : f32 to vector<8x1024xf32>
    %104 = arith.mulf %103, %100 : vector<8x1024xf32>
    %105 = arith.select %102, %100, %104 : vector<8x1024xi1>, vector<8x1024xf32>
    %106 = arith.truncf %105 : vector<8x1024xf32> to vector<8x1024xbf16>
    %c0_44 = arith.constant 0 : index
    %c0_45 = arith.constant 0 : index
    %107 = vector.load %arg7[%c0_44, %c0_45] : memref<1024x128xbf16, #tpu.memory_space<vmem>>, vector<1024x128xbf16>
    %cst_46 = arith.constant dense<0.000000e+00> : vector<8x128xf32>
    %108 = tpu.matmul %106, %107, %cst_46 {dimension_numbers = #tpu.dot_dimension_numbers<[1], [0], [0], [1], [0, 0, 1, 1], [], []>} : vector<8x1024xbf16>, vector<1024x128xbf16>, vector<8x128xf32> -> vector<8x128xf32>
    %109 = vector.broadcast %7 : vector<1x128xf32> to vector<8x128xf32>
    %110 = arith.addf %108, %109 : vector<8x128xf32>
    %111 = math.tanh %110 : vector<8x128xf32>
    %c0_47 = arith.constant 0 : index
    %c0_48 = arith.constant 0 : index
    %112 = vector.load %arg8[%c0_47, %c0_48] : memref<8x128xf32, #tpu.memory_space<vmem>>, vector<8x128xf32>
    tpu.vector_store %arg8[%c0_47, %c0_48], %111 {strides = array<i32>} : memref<8x128xf32, #tpu.memory_space<vmem>>, vector<8x128xf32>,
    return
  }
  func.func @transform_0(%arg0: i32) -> (i32, i32) {
    %c0_i32 = arith.constant 0 : i32
    %c0_i32_0 = arith.constant 0 : i32
    return %arg0, %c0_i32 : i32, i32
  }
  func.func @transform_1(%arg0: i32) -> (i32, i32) {
    %c0_i32 = arith.constant 0 : i32
    %c0_i32_0 = arith.constant 0 : i32
    %c0_i32_1 = arith.constant 0 : i32
    return %c0_i32, %c0_i32_0 : i32, i32
  }
  func.func @transform_2(%arg0: i32) -> (i32, i32) {
    %c0_i32 = arith.constant 0 : i32
    %c0_i32_0 = arith.constant 0 : i32
    %c0_i32_1 = arith.constant 0 : i32
    return %c0_i32, %c0_i32_0 : i32, i32
  }
  func.func @transform_3(%arg0: i32) -> (i32, i32) {
    %c0_i32 = arith.constant 0 : i32
    %c0_i32_0 = arith.constant 0 : i32
    %c0_i32_1 = arith.constant 0 : i32
    return %c0_i32, %c0_i32_0 : i32, i32
  }
  func.func @transform_4(%arg0: i32) -> (i32, i32) {
    %c0_i32 = arith.constant 0 : i32
    %c0_i32_0 = arith.constant 0 : i32
    %c0_i32_1 = arith.constant 0 : i32
    return %c0_i32, %c0_i32_0 : i32, i32
  }
  func.func @transform_5(%arg0: i32) -> (i32, i32) {
    %c0_i32 = arith.constant 0 : i32
    %c0_i32_0 = arith.constant 0 : i32
    %c0_i32_1 = arith.constant 0 : i32
    return %c0_i32, %c0_i32_0 : i32, i32
  }
  func.func @transform_6(%arg0: i32) -> (i32, i32) {
    %c0_i32 = arith.constant 0 : i32
    %c0_i32_0 = arith.constant 0 : i32
    %c0_i32_1 = arith.constant 0 : i32
    return %c0_i32, %c0_i32_0 : i32, i32
  }
  func.func @transform_7(%arg0: i32) -> (i32, i32) {
    %c0_i32 = arith.constant 0 : i32
    %c0_i32_0 = arith.constant 0 : i32
    return %arg0, %c0_i32 : i32, i32
  }
}

</mosaic_0001>

<bundles_post_ra>
// kernel: generator_forward.1
= control target key start
LH: loop header
LB: loop body
LE: loop exit
PB: predicated region body
PF: predicated region fallthrough
CT: control target
= control target key end

     0   :  { %12 = vsyncpa [#allocation3], 0  ;;  %s5784_s0 = inlined_call_operand.vmem [shape: f32[32,16], index: 0, kind: input, shape index: {}]   ;;  %s5785_s1 = inlined_call_operand.vmem [shape: f32[1,3840], index: 1, kind: input, shape index: {}]   ;;  %s5786_s2 = inlined_call_operand.vmem [shape: bf16[16,128], index: 2, kind: input, shape index: {}]   ;;  %s5787_s3 = inlined_call_operand.hbm [shape: bf16[128,256], index: 3, kind: input, shape index: {}]   ;;  %s5788_s4 = inlined_call_operand.hbm [shape: bf16[256,512], index: 4, kind: input, shape index: {}]   ;;  %s5789_s5 = inlined_call_operand.hbm [shape: bf16[512,1024], index: 5, kind: input, shape index: {}]   ;;  %s5790_s6 = inlined_call_operand.hbm [shape: bf16[1024,128], index: 6, kind: input, shape index: {}]   ;;  %s5791_s7 = inlined_call_operand.vmem [shape: f32[32,128], index: 7, kind: output, shape index: {}]  }
   0x1   :  { %13 = vsyncpa [#allocation5], 0 }
   0x2   :  { %14 = vsyncpa [#allocation8], 0  ;;  %s5370_s24 = smov 0  }
   0x3 LB: > { %s5314_s25 = smov [#allocation4]   ;;  %s5376_s27 = sadd.s32 4294967295, %s5312_s24   ;;  %s5312_s24 = sphi %s5370_s24, %s20_s24  }
   0x4   : > { %s234_s26 = sshll.u32 %s5314_s25, 4  ;;  %p4375_p0 = scmp.ge.s32.totalorder %s5312_s24, 1  ;;  %s5381_s26 = int_to_ptr.vmem [resolvable:$true] %s234_s26 }
   0x5   : > { %p203_p1 = scmp.lt.s32.totalorder %s5312_s24, 5  ;;  %p5792_p2 = scmp.eq.s32.totalorder %s5376_s27, 0 }
   0x6   : > { %s5315_s29 = smov [#allocation2]   ;;  %s5316_s9 = smov [#allocation6]  }
   0x7   : > { %p5383_p3 = pnand %p4375_p0, %p203_p1  ;;  %s221_s30 = sshll.u32 %s5315_s29, 4  ;;  %s5389_s30 = int_to_ptr.vmem [resolvable:$true] %s221_s30 }
   0x8   : > { %s5397_s10 = sshll.u32 %s5316_s9, 4  ;;  %s5182_s13 = scalar_lea.hbm %s5788_s4, 8192  ;;  %s248_s10 = int_to_ptr.vmem [resolvable:$true] %s5397_s10 }
   0x9   : > { %s5794_s28 = scalar_select %p5383_p3, 1, 0 }
   0xa   : > { %p4922_p4 = pneg %p5383_p3  ;;  %p5183_p6 = scmp.ne.s32.totalorder %s5788_s4, %s5182_s13 }
   0xb   : > { %p5189_p10 = scmp.lt.u32.totalorder %s5182_s13, %s5788_s4 }
   0xc   : > { %p5393_p5 = pnand %p5792_p2, %p4922_p4 }
   0xe   : > { %p5407_p7 = pneg %p5393_p5 }
  0x10   : > { %p5185_p8 = pnand %p5407_p7, %p5183_p6 }
  0x12   : > { %p5186_p9 = pneg %p5185_p8 }
  0x14   : > { %p5191_p11 = pnand %p5189_p10, %p5186_p9 }
  0x16   : > { %5194 = shalt.err (!%p5191_p11)
}
  0x17   : > { %s5195_s19 = scalar_lea.vmem %s5381_s26, 8192  ;;  %p5203_p1 = scmp.lt.s32.totalorder %s5381_s26, %s5381_s26 }
  0x18   : > { %p5196_p12 = scmp.ne.s32.totalorder %s5381_s26, %s5195_s19  ;;  %p5204_p4 = scmp.lt.s32.totalorder %s5195_s19, %s5195_s19 }
  0x1a   : > { %p5198_p13 = pnand %p5196_p12, %p5407_p7  ;;  %p5205_p6 = por %p5204_p4, %p5203_p1 }
  0x1c   : > { %p5199_p0 = pneg %p5198_p13 }
  0x1e   : > { %p5206_p8 = pnand %p5205_p6, %p5199_p0 }
  0x20   : > { %5209 = shalt.err (!%p5206_p8)
}
  0x21   : > { %s5317_s20 = smov 256   ;;  %s5318_s21 = smov 16  }
  0x22   : > { %4928 = dma.hbm_to_vmem [thread:$0]  (!%p5393_p5), %s5788_s4, 8192, %s5381_s26, [#allocation5], %s5317_s20, %s5317_s20, %s5318_s21  }
  0x23   : > { %s5210_s9 = scalar_lea.hbm %s5787_s3, 2048 }
  0x24   : > { %p5211_p9 = scmp.ne.s32.totalorder %s5787_s3, %s5210_s9  ;;  %p5217_p12 = scmp.lt.u32.totalorder %s5210_s9, %s5787_s3 }
  0x26   : > { %p5213_p10 = pnand %p5211_p9, %p5407_p7 }
  0x28   : > { %p5214_p11 = pneg %p5213_p10 }
  0x2a   : > { %p5219_p13 = pnand %p5217_p12, %p5214_p11 }
  0x2c   : > { %5222 = shalt.err (!%p5219_p13)
}
  0x2d   : > { %s5223_s26 = scalar_lea.vmem %s5389_s30, 2048  ;;  %p5231_p6 = scmp.lt.s32.totalorder %s5389_s30, %s5389_s30 }
  0x2e   : > { %p5224_p0 = scmp.ne.s32.totalorder %s5389_s30, %s5223_s26  ;;  %p5232_p8 = scmp.lt.s32.totalorder %s5223_s26, %s5223_s26 }
  0x30   : > { %p5226_p1 = pnand %p5224_p0, %p5407_p7  ;;  %p5233_p9 = por %p5232_p8, %p5231_p6 }
  0x32   : > { %p5227_p4 = pneg %p5226_p1 }
  0x34   : > { %p5234_p10 = pnand %p5233_p9, %p5227_p4 }
  0x36   : > { %5237 = shalt.err (!%p5234_p10)
}
  0x37   : > { %s5319_s15 = smov 128   ;;  %s5320_s17 = smov 8  }
  0x38   : > { %4925 = dma.hbm_to_vmem [thread:$0]  (!%p5393_p5), %s5787_s3, 2048, %s5389_s30, [#allocation3], %s5319_s15, %s5319_s15, %s5320_s17  }
  0x39   : > { %s5238_s22 = scalar_lea.hbm %s5789_s5, 32768 }
  0x3a   : > { %p5239_p11 = scmp.ne.s32.totalorder %s5789_s5, %s5238_s22  ;;  %p5245_p0 = scmp.lt.u32.totalorder %s5238_s22, %s5789_s5 }
  0x3c   : > { %p5241_p12 = pnand %p5239_p11, %p5407_p7 }
  0x3e   : > { %p5242_p13 = pneg %p5241_p12 }
  0x40   : > { %p5247_p1 = pnand %p5245_p0, %p5242_p13 }
  0x42   : > { %5250 = shalt.err (!%p5247_p1)
}
  0x43   : > { %s5251_s11 = scalar_lea.vmem %s248_s10, 32768  ;;  %p5259_p9 = scmp.lt.s32.totalorder %s248_s10, %s248_s10 }
  0x44   : > { %p5252_p4 = scmp.ne.s32.totalorder %s248_s10, %s5251_s11  ;;  %p5260_p10 = scmp.lt.s32.totalorder %s5251_s11, %s5251_s11 }
  0x46   : > { %p5254_p6 = pnand %p5252_p4, %p5407_p7  ;;  %p5261_p2 = por %p5260_p10, %p5259_p9 }
  0x48   : > { %p5255_p8 = pneg %p5254_p6 }
  0x4a   : > { %p5262_p3 = pnand %p5261_p2, %p5255_p8 }
  0x4c   : > { %5265 = shalt.err (!%p5262_p3)
}
  0x4d   : > { %s5321_s30 = smov 512   ;;  %s5322_s12 = smov 32  }
  0x4e   : > { %4931 = dma.hbm_to_vmem [thread:$0]  (!%p5393_p5), %s5789_s5, 32768, %s248_s10, [#allocation5], %s5321_s30, %s5321_s30, %s5322_s12  }
  0x4f   : > { %s5323_s26 = smov [#allocation7]   ;;  %s5266_s19 = scalar_lea.hbm %s5790_s6, 8192 }
  0x50   : > { %s260_s15 = sshll.u32 %s5323_s26, 4  ;;  %p5267_p2 = scmp.ne.s32.totalorder %s5790_s6, %s5266_s19  ;;  %s261_s15 = int_to_ptr.vmem [resolvable:$true] %s260_s15 }
  0x51   : > { %p5273_p12 = scmp.lt.u32.totalorder %s5266_s19, %s5790_s6 }
  0x52   : > { %p5269_p3 = pnand %p5267_p2, %p5407_p7 }
  0x54   : > { %p5270_p11 = pneg %p5269_p3 }
  0x56   : > { %p5275_p13 = pnand %p5273_p12, %p5270_p11 }
  0x58   : > { %5278 = shalt.err (!%p5275_p13)
}
  0x59   : > { %s5279_s10 = scalar_lea.vmem %s261_s15, 8192  ;;  %p5287_p6 = scmp.lt.s32.totalorder %s261_s15, %s261_s15 }
  0x5a   : > { %p5280_p0 = scmp.ne.s32.totalorder %s261_s15, %s5279_s10  ;;  %p5288_p8 = scmp.lt.s32.totalorder %s5279_s10, %s5279_s10 }
  0x5c   : > { %p5282_p1 = pnand %p5280_p0, %p5407_p7  ;;  %p5289_p9 = por %p5288_p8, %p5287_p6 }
  0x5e   : > { %p5283_p4 = pneg %p5282_p1 }
  0x60   : > { %p5290_p10 = pnand %p5289_p9, %p5283_p4 }
  0x62   : > { %5293 = shalt.err (!%p5290_p10)
}
  0x63   : > { %s5324_s25 = smov 64   ;;  %s5325_s29 = smov 4  }
  0x64   : > { %4934 = dma.hbm_to_vmem [thread:$0]  (!%p5393_p5), %s5790_s6, 8192, %s261_s15, [#allocation8], %s5324_s25, %s5324_s25, %s5325_s29  }
  0x65   : > { %p5797_p2 = scmp.ne.s32.totalorder %s5794_s28, 0 }
  0x66   : > { %p5798_p3 = scmp.eq.s32.totalorder (!%p5797_p2), %s5376_s27, 0 }
  0x67   : > { %283 = sbr.rel (%p5797_p2) target bundleno = 1640 (0x668), region = 48 }
  0x6e   : > { %5299 = dma.done.wait (%p5798_p3), [#allocation3], 2048   ;;  %p5799_p7 = pmov %p5798_p3 }
  0x6f   : > { %p5800_p11 = pmov %p5798_p3 }
  0x70   : > { %5301 = vsyncadd (%p5799_p7), [#allocation3], 4294965248 }
  0x71   : > { %5303 = dma.done.wait (%p5800_p11), [#allocation5], 40960   ;;  %p5801_p12 = pmov %p5798_p3 }
  0x72   : > { %p5802_p13 = pmov %p5798_p3 }
  0x73   : > { %5305 = vsyncadd (%p5801_p12), [#allocation5], 4294926336 }
  0x74   : > { %5307 = dma.done.wait (%p5802_p13), [#allocation8], 8192   ;;  %p5803_p5 = pmov %p5798_p3 }
  0x75   : > { %p325_p0 = scmp.lt.s32.totalorder %s5376_s27, 3  ;;  %v5326_v0 = vmov 0.0   ;;  %vm5327_vm0 = vmmov 0   ;;  %v4967_v1 = vld [vmem:[%s5786_s2] sm:$0xff]   ;;  %vm358_vm1 = vcmask 130048   ;;  %v5328_v20 = vmov 0  }
  0x76   : > { %5309 = vsyncadd (%p5803_p5), [#allocation8], 4294959104  ;;  %4884 = vmatprep.subr.bf16.mxu0 %v5326_v0  ;;  %4886 = vmatprep.mubr.msk.bf16.mxu0 %vm5327_vm0, %v5326_v0  ;;  %v4968_v4 = vld [vmem:[#allocation2 + $0x4] ss:$8 sps:$4 sm:$0xff]   ;;  %v4970_v5 = vld [vmem:[#allocation2] ss:$8 sps:$4 sm:$0xff]  }
  0x77   : > { %s5805_s27 = smov (!%p325_p0, %s5376_s27), 3  ;;  %4885 = vmatpush3.bf16.msra.mxu0 %v4967_v1  ;;  %v4971_v6 = vld [vmem:[#allocation2 + $0x14] ss:$8 sps:$4 sm:$0xff]   ;;  %502 = vmatprep.subr.bf16.mxu1 %v4968_v4  ;;  %v4973_v7 = vld [vmem:[#allocation2 + $0x10] ss:$8 sps:$4 sm:$0xff]  }
  0x78   : > { %s4386_s28 = sshll.u32 %s5805_s27, 3  ;;  %503 = vmatpush1.bf16.msra.mxu1 %v4970_v5  ;;  %v4974_v8 = vld [vmem:[#allocation2 + $0x24] ss:$8 sps:$4 sm:$0xff]   ;;  %v4976_v9 = vld [vmem:[#allocation2 + $0x20] ss:$8 sps:$4 sm:$0xff]   ;;  %534 = vmatprep.mubr.bf16.mxu1 %v5328_v20 }
  0x79   : > { %s328_s30 = scalar_lea.vmem %s5784_s0, %s4386_s28  ;;  %504 = vmatprep.subr.bf16.mxu1 %v4971_v6  ;;  %v4977_v10 = vld [vmem:[#allocation2 + $0x34] ss:$8 sps:$4 sm:$0xff]   ;;  %v4979_v11 = vld [vmem:[#allocation2 + $0x30] ss:$8 sps:$4 sm:$0xff]   ;;  %v4980_v12 = vld [vmem:[#allocation2 + $0x44] ss:$8 sps:$4 sm:$0xff]   ;;  %s332_s12 = scalar_lea.vmem %s5791_s7, %s4386_s28 }
  0x7a   : > { %v342_v2 = vld [vmem:[%s328_s30] sm:$0xff]  ;;  %v4983_v14 = vld [vmem:[#allocation2 + $0x54] ss:$8 sps:$4 sm:$0xff]   ;;  %v4985_v15 = vld [vmem:[#allocation2 + $0x50] ss:$8 sps:$4 sm:$0xff]  }
  0x7b   : > { %v343_v3 = vpack.c.bf16 %v342_v2, %v342_v2  ;;  %v4982_v13 = vld [vmem:[#allocation2 + $0x40] ss:$8 sps:$4 sm:$0xff]   ;;  %v4986_v16 = vld [vmem:[#allocation2 + $0x64] ss:$8 sps:$4 sm:$0xff]   ;;  %v4989_v18 = vld [vmem:[#allocation2 + $0x74] ss:$8 sps:$4 sm:$0xff]  }
  0x7c   : > { %505 = vmatpush1.bf16.msra.mxu1 %v4973_v7  ;;  %v4988_v17 = vld [vmem:[#allocation2 + $0x60] ss:$8 sps:$4 sm:$0xff]   ;;  %v4991_v19 = vld [vmem:[#allocation2 + $0x70] ss:$8 sps:$4 sm:$0xff]   ;;  %v4994_v22 = vld [vmem:[#allocation4 + $0x4] ss:$16 sps:$4 sm:$0xff]  }
  0x7d   : > { %4887 = vmatmul.mubr.msk.bf16.vlgmr.msra.gmra.mrb[0].mxu0 %vm358_vm1, %v343_v3  ;;  %506 = vmatprep.subr.bf16.mxu1 %v4974_v8  ;;  %v4992_v21 = vld [vmem:[#allocation4] ss:$16 sps:$4 sm:$0xff]   ;;  %v4997_v23 = vld [vmem:[#allocation4 + $0xc] ss:$16 sps:$4 sm:$0xff]   ;;  %v4995_v32 = vld [vmem:[#allocation4 + $0x8] ss:$16 sps:$4 sm:$0xff]  }
  0x7e   : > { %1039 = vmatprep.subr.bf16.mxu0 %v4994_v22  ;;  %v4388_v24 = vld [vmem:[%s5785_s1] ss:$0 sm:$0xff]  ;;  %v5000_v34 = vld [vmem:[#allocation4 + $0x24] ss:$16 sps:$4 sm:$0xff]   ;;  %v5003_v35 = vld [vmem:[#allocation4 + $0x2c] ss:$16 sps:$4 sm:$0xff]  }
  0x7f   : > { %1040 = vmatpush1.bf16.msra.mxu0 %v4992_v21  ;;  %v4998_v36 = vld [vmem:[#allocation4 + $0x20] ss:$16 sps:$4 sm:$0xff]   ;;  %v5001_v37 = vld [vmem:[#allocation4 + $0x28] ss:$16 sps:$4 sm:$0xff]   ;;  %v5006_v38 = vld [vmem:[#allocation4 + $0x44] ss:$16 sps:$4 sm:$0xff]  }
  0x80   : > { %507 = vmatpush1.bf16.msra.mxu1 %v4976_v9  ;;  %1041 = vmatprep.subr.bf16.mxu0 %v5000_v34  ;;  %v5009_v39 = vld [vmem:[#allocation4 + $0x4c] ss:$16 sps:$4 sm:$0xff]   ;;  %v5004_v40 = vld [vmem:[#allocation4 + $0x40] ss:$16 sps:$4 sm:$0xff]   ;;  %v5007_v41 = vld [vmem:[#allocation4 + $0x48] ss:$16 sps:$4 sm:$0xff]  }
  0x81   : > { %508 = vmatprep.subr.bf16.mxu1 %v4977_v10  ;;  %v5012_v42 = vld [vmem:[#allocation4 + $0x64] ss:$16 sps:$4 sm:$0xff]   ;;  %v5015_v43 = vld [vmem:[#allocation4 + $0x6c] ss:$16 sps:$4 sm:$0xff]   ;;  %v5010_v44 = vld [vmem:[#allocation4 + $0x60] ss:$16 sps:$4 sm:$0xff]  }
  0x82   : > { %v5013_v45 = vld [vmem:[#allocation4 + $0x68] ss:$16 sps:$4 sm:$0xff]   ;;  %v5018_v46 = vld [vmem:[#allocation4 + $0x84] ss:$16 sps:$4 sm:$0xff]   ;;  %v5021_v47 = vld [vmem:[#allocation4 + $0x8c] ss:$16 sps:$4 sm:$0xff]  }
  0x83   : > { %1042 = vmatpush1.bf16.msra.mxu0 %v4998_v36  ;;  %v5016_v48 = vld [vmem:[#allocation4 + $0x80] ss:$16 sps:$4 sm:$0xff]   ;;  %v5019_v49 = vld [vmem:[#allocation4 + $0x88] ss:$16 sps:$4 sm:$0xff]   ;;  %v5024_v50 = vld [vmem:[#allocation4 + $0xa4] ss:$16 sps:$4 sm:$0xff]  }
  0x84   : > { %509 = vmatpush1.bf16.msra.mxu1 %v4979_v11  ;;  %1043 = vmatprep.subr.bf16.mxu0 %v5006_v38  ;;  %v5027_v51 = vld [vmem:[#allocation4 + $0xac] ss:$16 sps:$4 sm:$0xff]   ;;  %v5022_v52 = vld [vmem:[#allocation4 + $0xa0] ss:$16 sps:$4 sm:$0xff]   ;;  %v5025_v53 = vld [vmem:[#allocation4 + $0xa8] ss:$16 sps:$4 sm:$0xff]  }
  0x85   : > { %510 = vmatprep.subr.bf16.mxu1 %v4980_v12  ;;  %v5030_v54 = vld [vmem:[#allocation4 + $0xc4] ss:$16 sps:$4 sm:$0xff]   ;;  %v5028_v55 = vld [vmem:[#allocation4 + $0xc0] ss:$16 sps:$4 sm:$0xff]   ;;  %v5031_v56 = vld [vmem:[#allocation4 + $0xc8] ss:$16 sps:$4 sm:$0xff]  }
  0x86   : > { %v5033_v57 = vld [vmem:[#allocation4 + $0xcc] ss:$16 sps:$4 sm:$0xff]   ;;  %v5036_v58 = vld [vmem:[#allocation4 + $0xe4] ss:$16 sps:$4 sm:$0xff]   ;;  %v5034_v60 = vld [vmem:[#allocation4 + $0xe0] ss:$16 sps:$4 sm:$0xff]  }
  0x87   : > { %1044 = vmatpush1.bf16.msra.mxu0 %v5004_v40  ;;  %v5039_v59 = vld [vmem:[#allocation4 + $0xec] ss:$16 sps:$4 sm:$0xff]   ;;  %v5037_v61 = vld [vmem:[#allocation4 + $0xe8] ss:$16 sps:$4 sm:$0xff]   ;;  %v5042_v62 = vld [vmem:[#allocation4 + $0x104] ss:$16 sps:$4 sm:$0xff]  }
  0x88   : > { %511 = vmatpush1.bf16.msra.mxu1 %v4982_v13  ;;  %1045 = vmatprep.subr.bf16.mxu0 %v5012_v42  ;;  %v5045_v63 = vld [vmem:[#allocation4 + $0x10c] ss:$16 sps:$4 sm:$0xff]   ;;  %v5040_v0 = vld [vmem:[#allocation4 + $0x100] ss:$16 sps:$4 sm:$0xff]   ;;  %v5043_v1 = vld [vmem:[#allocation4 + $0x108] ss:$16 sps:$4 sm:$0xff]  }
  0x89   : > { %512 = vmatprep.subr.bf16.mxu1 %v4983_v14  ;;  %v5048_v2 = vld [vmem:[#allocation4 + $0x124] ss:$16 sps:$4 sm:$0xff]   ;;  %v5051_v3 = vld [vmem:[#allocation4 + $0x12c] ss:$16 sps:$4 sm:$0xff]   ;;  %v5046_v4 = vld [vmem:[#allocation4 + $0x120] ss:$16 sps:$4 sm:$0xff]  }
  0x8a   : > { %v5049_v5 = vld [vmem:[#allocation4 + $0x128] ss:$16 sps:$4 sm:$0xff]   ;;  %v5054_v6 = vld [vmem:[#allocation4 + $0x144] ss:$16 sps:$4 sm:$0xff]   ;;  %v5057_v7 = vld [vmem:[#allocation4 + $0x14c] ss:$16 sps:$4 sm:$0xff]  }
  0x8b   : > { %1046 = vmatpush1.bf16.msra.mxu0 %v5010_v44  ;;  %v5052_v8 = vld [vmem:[#allocation4 + $0x140] ss:$16 sps:$4 sm:$0xff]   ;;  %v5055_v9 = vld [vmem:[#allocation4 + $0x148] ss:$16 sps:$4 sm:$0xff]   ;;  %v5060_v10 = vld [vmem:[#allocation4 + $0x164] ss:$16 sps:$4 sm:$0xff]  }
  0x8c   : > { %513 = vmatpush1.bf16.msra.mxu1 %v4985_v15  ;;  %1047 = vmatprep.subr.bf16.mxu0 %v5018_v46  ;;  %v5063_v11 = vld [vmem:[#allocation4 + $0x16c] ss:$16 sps:$4 sm:$0xff]   ;;  %v5058_v12 = vld [vmem:[#allocation4 + $0x160] ss:$16 sps:$4 sm:$0xff]   ;;  %v5061_v13 = vld [vmem:[#allocation4 + $0x168] ss:$16 sps:$4 sm:$0xff]  }
  0x8d   : > { %514 = vmatprep.subr.bf16.mxu1 %v4986_v16  ;;  %v5066_v14 = vld [vmem:[#allocation4 + $0x184] ss:$16 sps:$4 sm:$0xff]   ;;  %v5069_v15 = vld [vmem:[#allocation4 + $0x18c] ss:$16 sps:$4 sm:$0xff]   ;;  %v5064_v16 = vld [vmem:[#allocation4 + $0x180] ss:$16 sps:$4 sm:$0xff]  }
  0x8e   : > { %v5070_v20 = vld [vmem:[#allocation4 + $0x1a0] ss:$16 sps:$4 sm:$0xff]   ;;  %v5073_v21 = vld [vmem:[#allocation4 + $0x1a8] ss:$16 sps:$4 sm:$0xff]   ;;  %v5078_v22 = vld [vmem:[#allocation4 + $0x1c4] ss:$16 sps:$4 sm:$0xff]  }
  0x8f   : > { %1048 = vmatpush1.bf16.msra.mxu0 %v5016_v48 }
  0x90   : > { %515 = vmatpush1.bf16.msra.mxu1 %v4988_v17  ;;  %1049 = vmatprep.subr.bf16.mxu0 %v5024_v50  ;;  %v5067_v17 = vld [vmem:[#allocation4 + $0x188] ss:$16 sps:$4 sm:$0xff]  }
  0x91   : > { %516 = vmatprep.subr.bf16.mxu1 %v4989_v18  ;;  %v5072_v18 = vld [vmem:[#allocation4 + $0x1a4] ss:$16 sps:$4 sm:$0xff]  }
  0x93   : > { %1050 = vmatpush1.bf16.msra.mxu0 %v5022_v52 }
  0x94   : > { %517 = vmatpush1.bf16.msra.mxu1 %v4991_v19  ;;  %1051 = vmatprep.subr.bf16.mxu0 %v5030_v54  ;;  %v5075_v19 = vld [vmem:[#allocation4 + $0x1ac] ss:$16 sps:$4 sm:$0xff]  }
  0x95   : > { %1080 = vmatprep.subr.bf16.mxu1 %v4997_v23  ;;  %v5081_v23 = vld [vmem:[#allocation4 + $0x1cc] ss:$16 sps:$4 sm:$0xff]  }
  0x97   : > { %1052 = vmatpush1.bf16.msra.mxu0 %v5028_v55 }
  0x98   : > { %1053 = vmatprep.subr.bf16.mxu0 %v5036_v58 }
  0x9b   : > { %1054 = vmatpush1.bf16.msra.mxu0 %v5034_v60 }
  0x9c   : > { %1055 = vmatprep.subr.bf16.mxu0 %v5042_v62 }
  0x9f   : > { %1056 = vmatpush1.bf16.msra.mxu0 %v5040_v0 }
  0xa0   : > { %1057 = vmatprep.subr.bf16.mxu0 %v5048_v2 }
  0xa3   : > { %1058 = vmatpush1.bf16.msra.mxu0 %v5046_v4 }
  0xa4   : > { %1059 = vmatprep.subr.bf16.mxu0 %v5054_v6  ;;  %v5329_v6 = vmov 1966171168  }
  0xa7   : > { %1060 = vmatpush1.bf16.msra.mxu0 %v5052_v8  ;;  %v587_v8 = vlaneseq }
  0xa8   : > { %1061 = vmatprep.subr.bf16.mxu0 %v5060_v10 }
  0xa9   : > { %v5518_v10 = vshrl.u32 %v587_v8, 7 }
  0xab   : > { %1062 = vmatpush1.bf16.msra.mxu0 %v5058_v12 }
  0xac   : > { %1063 = vmatprep.subr.bf16.mxu0 %v5066_v14 }
  0xaf   : > { %1064 = vmatpush1.bf16.msra.mxu0 %v5064_v16  ;;  %v335_v16 = vld [vmem:[%s5785_s1 + $0x1] sm:$0x3] }
  0xb0   : > { %1065 = vmatprep.subr.bf16.mxu0 %v5072_v18  ;;  %v5529_v18 = vsub.s32 0, %v5518_v10 }
  0xb3   : > { %1066 = vmatpush1.bf16.msra.mxu0 %v5070_v20 }
  0xb4   : > { %1067 = vmatprep.subr.bf16.mxu0 %v5078_v22 }
 0x150   : > { %v396_v25 = vpop.f32.mrb[0].mxu0 }
 0x151   : > { %v397_v26 = vadd.f32 %v4388_v24, %v396_v25  ;;  %v4888_v27 = vpop.f32.mrb[1].mxu0  ;;  %v5076_v24 = vld [vmem:[#allocation4 + $0x1c0] ss:$16 sps:$4 sm:$0xff]   ;;  %v5079_v25 = vld [vmem:[#allocation4 + $0x1c8] ss:$16 sps:$4 sm:$0xff]  }
 0x152   : > { %v399_v28 = vpop.f32.mrb[2].mxu0  ;;  %1068 = vmatpush1.bf16.msra.mxu0 %v5076_v24  ;;  %v5082_v27 = vld [vmem:[#allocation4 + $0x1e0] ss:$16 sps:$4 sm:$0xff]  }
 0x153   : > { %vm402_vm2 = vcmp.gt.f32.partialorder %v397_v26, 0.0  ;;  %v403_v29 = vmul.f32 0.2, %v397_v26  ;;  %v4889_v30 = vpop.f32.mrb[3].mxu0  ;;  %v5087_v28 = vld [vmem:[#allocation4 + $0x1ec] ss:$16 sps:$4 sm:$0xff]  }
 0x155   : > { %v404_v31 = vsel %vm402_vm2, %v397_v26, %v403_v29  ;;  %v5084_v26 = vld [vmem:[#allocation4 + $0x1e4] ss:$16 sps:$4 sm:$0xff]   ;;  %v5085_v29 = vld [vmem:[#allocation4 + $0x1e8] ss:$16 sps:$4 sm:$0xff]  }
 0x156   : > { %v405_v33 = vpack.c.bf16 %v404_v31, %v404_v31  ;;  %1069 = vmatprep.subr.bf16.mxu0 %v5084_v26 }
 0x157   : > { %1070 = vmatpush1.bf16.msra.mxu0 %v5082_v27 }
 0x158   : > { %535 = vmatmul.mubr.bf16.vlgmr.msra.gmra.mrb[0].mxu1 %v405_v33 }
 0x159   : > { %1081 = vmatpush1.bf16.msra.mxu1 %v4995_v32 }
 0x15a   : > { %1082 = vmatprep.subr.bf16.mxu1 %v5003_v35 }
 0x15d   : > { %1083 = vmatpush1.bf16.msra.mxu1 %v5001_v37 }
 0x15e   : > { %1084 = vmatprep.subr.bf16.mxu1 %v5009_v39 }
 0x161   : > { %1085 = vmatpush1.bf16.msra.mxu1 %v5007_v41 }
 0x162   : > { %1086 = vmatprep.subr.bf16.mxu1 %v5015_v43 }
 0x165   : > { %1087 = vmatpush1.bf16.msra.mxu1 %v5013_v45 }
 0x166   : > { %1088 = vmatprep.subr.bf16.mxu1 %v5021_v47 }
 0x169   : > { %1089 = vmatpush1.bf16.msra.mxu1 %v5019_v49 }
 0x16a   : > { %1090 = vmatprep.subr.bf16.mxu1 %v5027_v51 }
 0x16d   : > { %1091 = vmatpush1.bf16.msra.mxu1 %v5025_v53 }
 0x16e   : > { %1092 = vmatprep.subr.bf16.mxu1 %v5033_v57 }
 0x171   : > { %1093 = vmatpush1.bf16.msra.mxu1 %v5031_v56 }
 0x172   : > { %1094 = vmatprep.subr.bf16.mxu1 %v5039_v59 }
 0x175   : > { %1095 = vmatpush1.bf16.msra.mxu1 %v5037_v61 }
 0x176   : > { %1096 = vmatprep.subr.bf16.mxu1 %v5045_v63 }
 0x179   : > { %1097 = vmatpush1.bf16.msra.mxu1 %v5043_v1 }
 0x17a   : > { %1098 = vmatprep.subr.bf16.mxu1 %v5051_v3 }
 0x17d   : > { %1099 = vmatpush1.bf16.msra.mxu1 %v5049_v5 }
 0x17e   : > { %1100 = vmatprep.subr.bf16.mxu1 %v5057_v7  ;;  %v585_v7 = vunpack.c.l.s4 %v5329_v6  ;;  %v1356_v6 = vld [vmem:[#allocation6 + $0xe8] sm:$0xff] }
 0x181   : > { %1101 = vmatpush1.bf16.msra.mxu1 %v5055_v9  ;;  %v586_v9 = vunpack.c.0.s8 %v585_v7 }
 0x182   : > { %1102 = vmatprep.subr.bf16.mxu1 %v5063_v11 }
 0x183   : > { %v5521_v12 = vsub.s32 %v586_v9, %v5518_v10 }
 0x185   : > { %1103 = vmatpush1.bf16.msra.mxu1 %v5061_v13 }
 0x186   : > { %1104 = vmatprep.subr.bf16.mxu1 %v5069_v15 }
 0x189   : > { %1105 = vmatpush1.bf16.msra.mxu1 %v5067_v17 }
 0x18a   : > { %1106 = vmatprep.subr.bf16.mxu1 %v5075_v19  ;;  %v5532_v19 = vsub.s32 1, %v5518_v10 }
 0x18d   : > { %1107 = vmatpush1.bf16.msra.mxu1 %v5073_v21 }
 0x18e   : > { %1108 = vmatprep.subr.bf16.mxu1 %v5081_v23 }
 0x191   : > { %1109 = vmatpush1.bf16.msra.mxu1 %v5079_v25 }
 0x192   : > { %1110 = vmatprep.subr.bf16.mxu1 %v5087_v28 }
 0x195   : > { %1111 = vmatpush1.bf16.msra.mxu1 %v5085_v29  ;;  %v336_v29 = vld [vmem:[%s5785_s1 + $0x3] sm:$0x3] }
 0x22b   : > { %v536_v30 = vpop.f32.mrb[0].mxu1 }
 0x22c   : > { %v543_v31 = vrot.slane %v536_v30, 4  ;;  %v557_v32 = vmul.f32 %v536_v30, %v536_v30  ;;  %v538_v33 = vpop.f32.mrb[1].mxu1 }
 0x22d   : > { %v549_v34 = vrot.slane %v538_v33, 4  ;;  %v558_v35 = vmul.f32 %v538_v33, %v538_v33  ;;  %v540_v36 = vpop.f32.mrb[2].mxu1 }
 0x22e   : > { %v544_v37 = vadd.f32 %v543_v31, %v536_v30  ;;  %v559_v38 = vrot.slane %v557_v32, 4  ;;  %v541_v39 = vpop.f32.mrb[3].mxu1 }
 0x22f   : > { %v550_v40 = vadd.f32 %v549_v34, %v538_v33  ;;  %v565_v41 = vrot.slane %v558_v35, 4 }
 0x230   : > { %v545_v42 = vrot.slane %v544_v37, 2  ;;  %v560_v43 = vadd.f32 %v559_v38, %v557_v32 }
 0x231   : > { %v551_v44 = vrot.slane %v550_v40, 2  ;;  %v566_v45 = vadd.f32 %v565_v41, %v558_v35 }
 0x232   : > { %v546_v46 = vadd.f32 %v545_v42, %v544_v37  ;;  %v561_v47 = vrot.slane %v560_v43, 2  ;;  %v1327_v42 = vld [vmem:[#allocation6] sm:$0xff] }
 0x233   : > { %v552_v48 = vadd.f32 %v551_v44, %v550_v40  ;;  %v567_v49 = vrot.slane %v566_v45, 2  ;;  %v1328_v44 = vld [vmem:[#allocation6 + $0x8] sm:$0xff] }
 0x234   : > { %v547_v50 = vrot.slane %v546_v46, 1  ;;  %v562_v51 = vadd.f32 %v561_v47, %v560_v43  ;;  %v1331_v43 = vld [vmem:[#allocation6 + $0x20] sm:$0xff] }
 0x235   : > { %v553_v52 = vrot.slane %v552_v48, 1  ;;  %v568_v53 = vadd.f32 %v567_v49, %v566_v45  ;;  %v4472_v45 = vcombine.high %v1327_v42, %v1331_v43  ;;  %v4471_v47 = vcombine.low %v1327_v42, %v1331_v43  ;;  %v1388_v42 = vld [vmem:[#allocation6 + $0x1e8] sm:$0xff] }
 0x236   : > { %v548_v54 = vadd.f32 %v547_v50, %v546_v46  ;;  %v563_v55 = vrot.slane %v562_v51, 1  ;;  %v1332_v46 = vld [vmem:[#allocation6 + $0x28] sm:$0xff]  ;;  %v1335_v50 = vld [vmem:[#allocation6 + $0x40] sm:$0xff] }
 0x237   : > { %v554_v56 = vadd.f32 %v553_v52, %v552_v48  ;;  %v569_v57 = vrot.slane %v568_v53, 1  ;;  %v4473_v48 = vcombine.low %v1328_v44, %v1332_v46  ;;  %v4474_v49 = vcombine.high %v1328_v44, %v1332_v46  ;;  %2863 = vmatprep.subr.bf16.mxu0 %v4472_v45  ;;  %v1336_v52 = vld [vmem:[#allocation6 + $0x48] sm:$0xff]  ;;  %v1391_v46 = vld [vmem:[#allocation6 + $0x200] sm:$0xff] }
 0x238   : > { %v555_v58 = vmul.f32 0.125, %v548_v54  ;;  %v564_v59 = vadd.f32 %v563_v55, %v562_v51  ;;  %v1339_v51 = vld [vmem:[#allocation6 + $0x60] sm:$0xff]  ;;  %v1340_v54 = vld [vmem:[#allocation6 + $0x68] sm:$0xff] }
 0x239   : > { %v556_v60 = vmul.f32 0.125, %v554_v56  ;;  %v570_v61 = vadd.f32 %v569_v57, %v568_v53  ;;  %2945 = vmatprep.subr.bf16.mxu1 %v4474_v49  ;;  %v4480_v53 = vcombine.high %v1335_v50, %v1339_v51  ;;  %v4479_v55 = vcombine.low %v1335_v50, %v1339_v51  ;;  %v1396_v50 = vld [vmem:[#allocation6 + $0x228] sm:$0xff] }
 0x23a   : > { %v571_v62 = vmul.f32 0.125, %v564_v59  ;;  %v573_v63 = vmul.f32 %v555_v58, %v555_v58  ;;  %v4481_v56 = vcombine.low %v1336_v52, %v1340_v54  ;;  %v4482_v57 = vcombine.high %v1336_v52, %v1340_v54  ;;  %v1347_v59 = vld [vmem:[#allocation6 + $0xa0] sm:$0xff] }
 0x23b   : > { %v572_v0 = vmul.f32 0.125, %v570_v61  ;;  %v574_v1 = vmul.f32 %v556_v60, %v556_v60  ;;  %v1399_v54 = vld [vmem:[#allocation6 + $0x240] sm:$0xff] }
 0x23c   : > { %v575_v2 = vsub.f32 %v571_v62, %v573_v63  ;;  %v1348_v62 = vld [vmem:[#allocation6 + $0xa8] sm:$0xff] }
 0x23d   : > { %v576_v3 = vsub.f32 %v572_v0, %v574_v1 }
 0x23e   : > { %v577_v4 = vadd.f32 0.8, %v575_v2  ;;  %v1351_v2 = vld [vmem:[#allocation6 + $0xc0] sm:$0xff] }
 0x23f   : > { %v578_v5 = vadd.f32 0.8, %v576_v3  ;;  %v1355_v3 = vld [vmem:[#allocation6 + $0xe0] sm:$0xff] }
 0x240   : > { %5152 = vrsqrt.f32 %v577_v4  ;;  %v1352_v4 = vld [vmem:[#allocation6 + $0xc8] sm:$0xff]  ;;  %v4495_v7 = vcombine.low %v1351_v2, %v1355_v3 }
 0x241   : > { %5154 = vrsqrt.f32 %v578_v5  ;;  %v4496_v5 = vcombine.high %v1351_v2, %v1355_v3  ;;  %v4497_v8 = vcombine.low %v1352_v4, %v1356_v6  ;;  %v4498_v9 = vcombine.high %v1352_v4, %v1356_v6  ;;  %v1412_v2 = vld [vmem:[#allocation6 + $0x2a8] sm:$0xff]  ;;  %v1415_v6 = vld [vmem:[#allocation6 + $0x2c0] sm:$0xff] }
 0x24a   : > { %v5153_v11 = vpop.eup %5152 }
 0x24b   : > { %v5155_v13 = vpop.eup %5154 }
 0x24c   : > { %v583_v14 = vcombine.low %v5153_v11, %v5155_v13  ;;  %v1359_v11 = vld [vmem:[#allocation6 + $0x100] sm:$0xff] }
 0x24d   : > { %v1363_v13 = vld [vmem:[#allocation6 + $0x120] sm:$0xff] }
 0x24e   : > { %v590_v15 = vrot.slane %v583_v14, %v5521_v12  ;;  %v1360_v14 = vld [vmem:[#allocation6 + $0x108] sm:$0xff] }
 0x250   : > { %v597_v17 = vrot.slane %v590_v15, %v5521_v12  ;;  %v4504_v15 = vcombine.high %v1359_v11, %v1363_v13 }
 0x252   : > { %v599_v20 = vmul.f32 %v597_v17, %v335_v16  ;;  %v1364_v16 = vld [vmem:[#allocation6 + $0x128] sm:$0xff]  ;;  %v4503_v17 = vcombine.low %v1359_v11, %v1363_v13 }
 0x253   : > { %v1420_v11 = vld [vmem:[#allocation6 + $0x2e8] sm:$0xff] }
 0x254   : > { %v604_v21 = vrot.slane %v599_v20, %v5529_v18  ;;  %v608_v22 = vrot.slane %v599_v20, %v5532_v19  ;;  %v4505_v20 = vcombine.low %v1360_v14, %v1364_v16 }
 0x256   : > { %v611_v23 = vmul.f32 %v604_v21, %v536_v30  ;;  %v612_v24 = vmul.f32 %v608_v22, %v538_v33  ;;  %v613_v25 = vmul.f32 %v604_v21, %v555_v58  ;;  %v614_v26 = vmul.f32 %v608_v22, %v556_v60  ;;  %v1343_v58 = vld [vmem:[#allocation6 + $0x80] sm:$0xff]  ;;  %v1344_v60 = vld [vmem:[#allocation6 + $0x88] sm:$0xff] }
 0x257   : > { %v4488_v61 = vcombine.high %v1343_v58, %v1347_v59  ;;  %v4487_v63 = vcombine.low %v1343_v58, %v1347_v59  ;;  %v4489_v0 = vcombine.low %v1344_v60, %v1348_v62  ;;  %v4490_v1 = vcombine.high %v1344_v60, %v1348_v62  ;;  %v1367_v22 = vld [vmem:[#allocation6 + $0x140] sm:$0xff]  ;;  %v1404_v58 = vld [vmem:[#allocation6 + $0x268] sm:$0xff] }
 0x258   : > { %v617_v27 = vcombine.low %v613_v25, %v614_v26  ;;  %v4506_v21 = vcombine.high %v1360_v14, %v1364_v16  ;;  %v1372_v26 = vld [vmem:[#allocation6 + $0x168] sm:$0xff]  ;;  %v1407_v62 = vld [vmem:[#allocation6 + $0x280] sm:$0xff] }
 0x259   : > { %v1423_v16 = vld [vmem:[#allocation6 + $0x300] sm:$0xff] }
 0x25a   : > { %v624_v28 = vrot.slane %v617_v27, %v5521_v12 }
 0x25c   : > { %v631_v31 = vrot.slane %v624_v28, %v5521_v12 }
 0x25e   : > { %v633_v32 = vsub.f32 %v336_v29, %v631_v31  ;;  %v1375_v31 = vld [vmem:[#allocation6 + $0x180] sm:$0xff] }
 0x260   : > { %v638_v34 = vrot.slane %v633_v32, %v5529_v18  ;;  %v642_v35 = vrot.slane %v633_v32, %v5532_v19  ;;  %v1379_v32 = vld [vmem:[#allocation6 + $0x1a0] sm:$0xff] }
 0x262   : > { %v646_v36 = vadd.f32 %v642_v35, %v612_v24  ;;  %v645_v37 = vadd.f32 %v638_v34, %v611_v23  ;;  %v1371_v23 = vld [vmem:[#allocation6 + $0x160] sm:$0xff]  ;;  %v1368_v24 = vld [vmem:[#allocation6 + $0x148] sm:$0xff]  ;;  %v4520_v35 = vcombine.high %v1375_v31, %v1379_v32 }
 0x263   : > { %v4512_v25 = vcombine.high %v1367_v22, %v1371_v23  ;;  %v4511_v27 = vcombine.low %v1367_v22, %v1371_v23  ;;  %v4513_v28 = vcombine.low %v1368_v24, %v1372_v26  ;;  %v4514_v29 = vcombine.high %v1368_v24, %v1372_v26  ;;  %v1376_v34 = vld [vmem:[#allocation6 + $0x188] sm:$0xff]  ;;  %v1431_v26 = vld [vmem:[#allocation6 + $0x340] sm:$0xff] }
 0x264   : > { %vm648_vm3 = vcmp.gt.f32.partialorder %v646_v36, 0.0  ;;  %v650_v30 = vmul.f32 0.2, %v646_v36  ;;  %vm647_vm4 = vcmp.gt.f32.partialorder %v645_v37, 0.0  ;;  %v649_v33 = vmul.f32 0.2, %v645_v37 }
 0x265   : > { %v1428_v22 = vld [vmem:[#allocation6 + $0x328] sm:$0xff] }
 0x266   : > { %v652_v38 = vsel %vm648_vm3, %v646_v36, %v650_v30  ;;  %v651_v39 = vsel %vm647_vm4, %v645_v37, %v649_v33  ;;  %v1380_v36 = vld [vmem:[#allocation6 + $0x1a8] sm:$0xff]  ;;  %v4519_v37 = vcombine.low %v1375_v31, %v1379_v32 }
 0x267   : > { %v654_v40 = vpack.c.bf16 %v652_v38, %v652_v38  ;;  %v653_v41 = vpack.c.bf16 %v651_v39, %v651_v39  ;;  %v4521_v30 = vcombine.low %v1376_v34, %v1380_v36  ;;  %v4522_v33 = vcombine.high %v1376_v34, %v1380_v36  ;;  %v1383_v38 = vld [vmem:[#allocation6 + $0x1c0] sm:$0xff]  ;;  %v1436_v31 = vld [vmem:[#allocation6 + $0x368] sm:$0xff] }
 0x268   : > { %v1387_v39 = vld [vmem:[#allocation6 + $0x1e0] sm:$0xff] }
 0x269   : > { %1071 = vmatprep.mubr.bf16.mxu0 %v654_v40  ;;  %1112 = vmatprep.mubr.bf16.mxu1 %v654_v40  ;;  %v1384_v40 = vld [vmem:[#allocation6 + $0x1c8] sm:$0xff]  ;;  %v4527_v43 = vcombine.low %v1383_v38, %v1387_v39  ;;  %v1439_v36 = vld [vmem:[#allocation6 + $0x380] sm:$0xff] }
 0x26a   : > { %1072 = vmatmul.mubr.bf16.vlgmr.msra.gmra.mrb[4].mxu0 %v653_v41  ;;  %1113 = vmatmul.mubr.bf16.vlgmr.msra.gmra.mrb[4].mxu1 %v653_v41  ;;  %v4528_v41 = vcombine.high %v1383_v38, %v1387_v39  ;;  %v4529_v44 = vcombine.low %v1384_v40, %v1388_v42  ;;  %v4530_v45 = vcombine.high %v1384_v40, %v1388_v42  ;;  %v1444_v38 = vld [vmem:[#allocation6 + $0x3a8] sm:$0xff]  ;;  %v1447_v42 = vld [vmem:[#allocation6 + $0x3c0] sm:$0xff] }
 0x26b   : > { %2864 = vmatpush1.bf16.msra.mxu0 %v4471_v47  ;;  %2946 = vmatpush1.bf16.msra.mxu1 %v4473_v48  ;;  %v1395_v47 = vld [vmem:[#allocation6 + $0x220] sm:$0xff]  ;;  %v1392_v48 = vld [vmem:[#allocation6 + $0x208] sm:$0xff] }
 0x26c   : > { %2865 = vmatprep.subr.bf16.mxu0 %v4480_v53  ;;  %2947 = vmatprep.subr.bf16.mxu1 %v4482_v57  ;;  %v4536_v49 = vcombine.high %v1391_v46, %v1395_v47  ;;  %v4535_v51 = vcombine.low %v1391_v46, %v1395_v47  ;;  %v4537_v52 = vcombine.low %v1392_v48, %v1396_v50  ;;  %v1452_v47 = vld [vmem:[#allocation6 + $0x3e8] sm:$0xff] }
 0x26d   : > { %v4538_v53 = vcombine.high %v1392_v48, %v1396_v50  ;;  %v5543_v50 = vld [vmem:[#allocation6 + $0x400] sm:$0xff] }
 0x26f   : > { %2866 = vmatpush1.bf16.msra.mxu0 %v4479_v55  ;;  %2948 = vmatpush1.bf16.msra.mxu1 %v4481_v56  ;;  %v1403_v55 = vld [vmem:[#allocation6 + $0x260] sm:$0xff]  ;;  %v1400_v56 = vld [vmem:[#allocation6 + $0x248] sm:$0xff] }
 0x270   : > { %2867 = vmatprep.subr.bf16.mxu0 %v4488_v61  ;;  %2949 = vmatprep.subr.bf16.mxu1 %v4490_v1  ;;  %v4544_v57 = vcombine.high %v1399_v54, %v1403_v55  ;;  %v4543_v59 = vcombine.low %v1399_v54, %v1403_v55  ;;  %v4545_v60 = vcombine.low %v1400_v56, %v1404_v58  ;;  %v5551_v54 = vld [vmem:[#allocation6 + $0x428] sm:$0xff] }
 0x271   : > { %v4546_v61 = vcombine.high %v1400_v56, %v1404_v58 }
 0x273   : > { %2868 = vmatpush1.bf16.msra.mxu0 %v4487_v63  ;;  %2950 = vmatpush1.bf16.msra.mxu1 %v4489_v0  ;;  %v1411_v63 = vld [vmem:[#allocation6 + $0x2a0] sm:$0xff]  ;;  %v1408_v0 = vld [vmem:[#allocation6 + $0x288] sm:$0xff] }
 0x274   : > { %2869 = vmatprep.subr.bf16.mxu0 %v4496_v5  ;;  %2951 = vmatprep.subr.bf16.mxu1 %v4498_v9  ;;  %v4552_v1 = vcombine.high %v1407_v62, %v1411_v63  ;;  %v4551_v3 = vcombine.low %v1407_v62, %v1411_v63  ;;  %v4553_v4 = vcombine.low %v1408_v0, %v1412_v2 }
 0x275   : > { %v4554_v5 = vcombine.high %v1408_v0, %v1412_v2 }
 0x277   : > { %2870 = vmatpush1.bf16.msra.mxu0 %v4495_v7  ;;  %2952 = vmatpush1.bf16.msra.mxu1 %v4497_v8  ;;  %v1419_v7 = vld [vmem:[#allocation6 + $0x2e0] sm:$0xff]  ;;  %v1416_v8 = vld [vmem:[#allocation6 + $0x2c8] sm:$0xff] }
 0x278   : > { %2871 = vmatprep.subr.bf16.mxu0 %v4504_v15  ;;  %2953 = vmatprep.subr.bf16.mxu1 %v4506_v21  ;;  %v4560_v9 = vcombine.high %v1415_v6, %v1419_v7  ;;  %v4559_v13 = vcombine.low %v1415_v6, %v1419_v7  ;;  %v4561_v14 = vcombine.low %v1416_v8, %v1420_v11 }
 0x279   : > { %v4562_v15 = vcombine.high %v1416_v8, %v1420_v11 }
 0x27b   : > { %2872 = vmatpush1.bf16.msra.mxu0 %v4503_v17  ;;  %2954 = vmatpush1.bf16.msra.mxu1 %v4505_v20  ;;  %v1427_v17 = vld [vmem:[#allocation6 + $0x320] sm:$0xff]  ;;  %v1424_v20 = vld [vmem:[#allocation6 + $0x308] sm:$0xff] }
 0x27c   : > { %2873 = vmatprep.subr.bf16.mxu0 %v4512_v25  ;;  %2955 = vmatprep.subr.bf16.mxu1 %v4514_v29  ;;  %v4568_v21 = vcombine.high %v1423_v16, %v1427_v17  ;;  %v4567_v23 = vcombine.low %v1423_v16, %v1427_v17  ;;  %v4569_v24 = vcombine.low %v1424_v20, %v1428_v22 }
 0x27d   : > { %v4570_v25 = vcombine.high %v1424_v20, %v1428_v22 }
 0x27f   : > { %2874 = vmatpush1.bf16.msra.mxu0 %v4511_v27  ;;  %2956 = vmatpush1.bf16.msra.mxu1 %v4513_v28  ;;  %v1435_v27 = vld [vmem:[#allocation6 + $0x360] sm:$0xff]  ;;  %v1432_v28 = vld [vmem:[#allocation6 + $0x348] sm:$0xff] }
 0x280   : > { %2875 = vmatprep.subr.bf16.mxu0 %v4520_v35  ;;  %2957 = vmatprep.subr.bf16.mxu1 %v4522_v33  ;;  %v4576_v29 = vcombine.high %v1431_v26, %v1435_v27  ;;  %v4575_v32 = vcombine.low %v1431_v26, %v1435_v27  ;;  %v4577_v34 = vcombine.low %v1432_v28, %v1436_v31 }
 0x281   : > { %v4578_v35 = vcombine.high %v1432_v28, %v1436_v31 }
 0x283   : > { %2876 = vmatpush1.bf16.msra.mxu0 %v4519_v37  ;;  %2958 = vmatpush1.bf16.msra.mxu1 %v4521_v30  ;;  %v1443_v37 = vld [vmem:[#allocation6 + $0x3a0] sm:$0xff]  ;;  %v1440_v30 = vld [vmem:[#allocation6 + $0x388] sm:$0xff] }
 0x284   : > { %2877 = vmatprep.subr.bf16.mxu0 %v4528_v41  ;;  %2959 = vmatprep.subr.bf16.mxu1 %v4530_v45  ;;  %v4584_v33 = vcombine.high %v1439_v36, %v1443_v37  ;;  %v4583_v39 = vcombine.low %v1439_v36, %v1443_v37  ;;  %v4585_v40 = vcombine.low %v1440_v30, %v1444_v38 }
 0x285   : > { %v4586_v41 = vcombine.high %v1440_v30, %v1444_v38 }
 0x287   : > { %2878 = vmatpush1.bf16.msra.mxu0 %v4527_v43  ;;  %2960 = vmatpush1.bf16.msra.mxu1 %v4529_v44  ;;  %v1451_v43 = vld [vmem:[#allocation6 + $0x3e0] sm:$0xff]  ;;  %v1448_v44 = vld [vmem:[#allocation6 + $0x3c8] sm:$0xff] }
 0x288   : > { %2879 = vmatprep.subr.bf16.mxu0 %v4536_v49  ;;  %2961 = vmatprep.subr.bf16.mxu1 %v4538_v53  ;;  %v4591_v45 = vcombine.low %v1447_v42, %v1451_v43  ;;  %v4592_v46 = vcombine.high %v1447_v42, %v1451_v43  ;;  %v4593_v48 = vcombine.low %v1448_v44, %v1452_v47 }
 0x289   : > { %v4594_v49 = vcombine.high %v1448_v44, %v1452_v47 }
 0x28b   : > { %2880 = vmatpush1.bf16.msra.mxu0 %v4535_v51  ;;  %2962 = vmatpush1.bf16.msra.mxu1 %v4537_v52  ;;  %v5545_v51 = vld [vmem:[#allocation6 + $0x420] sm:$0xff]  ;;  %v5547_v52 = vld [vmem:[#allocation6 + $0x408] sm:$0xff] }
 0x28c   : > { %2881 = vmatprep.subr.bf16.mxu0 %v4544_v57  ;;  %2963 = vmatprep.subr.bf16.mxu1 %v4546_v61  ;;  %v4600_v53 = vcombine.high %v5543_v50, %v5545_v51  ;;  %v4599_v55 = vcombine.low %v5543_v50, %v5545_v51  ;;  %v4601_v56 = vcombine.low %v5547_v52, %v5551_v54 }
 0x28d   : > { %v4602_v57 = vcombine.high %v5547_v52, %v5551_v54 }
 0x28f   : > { %2882 = vmatpush1.bf16.msra.mxu0 %v4543_v59  ;;  %2964 = vmatpush1.bf16.msra.mxu1 %v4545_v60 }
 0x290   : > { %2883 = vmatprep.subr.bf16.mxu0 %v4552_v1  ;;  %2965 = vmatprep.subr.bf16.mxu1 %v4554_v5 }
 0x293   : > { %2884 = vmatpush1.bf16.msra.mxu0 %v4551_v3  ;;  %2966 = vmatpush1.bf16.msra.mxu1 %v4553_v4 }
 0x294   : > { %2885 = vmatprep.subr.bf16.mxu0 %v4560_v9  ;;  %2967 = vmatprep.subr.bf16.mxu1 %v4562_v15 }
 0x297   : > { %2886 = vmatpush1.bf16.msra.mxu0 %v4559_v13  ;;  %2968 = vmatpush1.bf16.msra.mxu1 %v4561_v14 }
 0x298   : > { %2887 = vmatprep.subr.bf16.mxu0 %v4568_v21  ;;  %2969 = vmatprep.subr.bf16.mxu1 %v4570_v25 }
 0x29b   : > { %2888 = vmatpush1.bf16.msra.mxu0 %v4567_v23  ;;  %2970 = vmatpush1.bf16.msra.mxu1 %v4569_v24 }
 0x29c   : > { %2889 = vmatprep.subr.bf16.mxu0 %v4576_v29  ;;  %2971 = vmatprep.subr.bf16.mxu1 %v4578_v35 }
 0x29f   : > { %2890 = vmatpush1.bf16.msra.mxu0 %v4575_v32  ;;  %2972 = vmatpush1.bf16.msra.mxu1 %v4577_v34 }
 0x2a0   : > { %2891 = vmatprep.subr.bf16.mxu0 %v4584_v33  ;;  %2973 = vmatprep.subr.bf16.mxu1 %v4586_v41 }
 0x2a3   : > { %2892 = vmatpush1.bf16.msra.mxu0 %v4583_v39  ;;  %2974 = vmatpush1.bf16.msra.mxu1 %v4585_v40 }
 0x2a4   : > { %2893 = vmatprep.subr.bf16.mxu0 %v4592_v46  ;;  %2975 = vmatprep.subr.bf16.mxu1 %v4594_v49 }
 0x2a7   : > { %2894 = vmatpush1.bf16.msra.mxu0 %v4591_v45  ;;  %2976 = vmatpush1.bf16.msra.mxu1 %v4593_v48 }
 0x2a8   : > { %2904 = vmatprep.subr.bf16.mxu0 %v4600_v53  ;;  %2986 = vmatprep.subr.bf16.mxu1 %v4602_v57 }
 0x33d   : > { %v5559_v58 = vpop.f32.mrb[4].mxu0  ;;  %v5561_v59 = vpop.f32.mrb[4].mxu1 }
 0x33e   : > { %v1121_v60 = vrot.slane %v5559_v58, 4  ;;  %v1149_v61 = vmul.f32 %v5559_v58, %v5559_v58  ;;  %v1133_v62 = vrot.slane %v5561_v59, 4  ;;  %v1151_v63 = vmul.f32 %v5561_v59, %v5561_v59  ;;  %v5569_v0 = vpop.f32.mrb[5].mxu0  ;;  %v5571_v1 = vpop.f32.mrb[5].mxu1 }
 0x33f   : > { %v1127_v2 = vrot.slane %v5569_v0, 4  ;;  %v1150_v3 = vmul.f32 %v5569_v0, %v5569_v0  ;;  %v1139_v4 = vrot.slane %v5571_v1, 4  ;;  %v1152_v5 = vmul.f32 %v5571_v1, %v5571_v1  ;;  %v1077_v6 = vpop.f32.mrb[6].mxu0  ;;  %v1118_v7 = vpop.f32.mrb[6].mxu1 }
 0x340   : > { %v1122_v8 = vadd.f32 %v1121_v60, %v5559_v58  ;;  %v1153_v9 = vrot.slane %v1149_v61, 4  ;;  %v1134_v11 = vadd.f32 %v1133_v62, %v5561_v59  ;;  %v1165_v13 = vrot.slane %v1151_v63, 4  ;;  %v1078_v14 = vpop.f32.mrb[7].mxu0  ;;  %v1119_v15 = vpop.f32.mrb[7].mxu1 }
 0x341   : > { %v1128_v16 = vadd.f32 %v1127_v2, %v5569_v0  ;;  %v1159_v17 = vrot.slane %v1150_v3, 4  ;;  %v1140_v20 = vadd.f32 %v1139_v4, %v5571_v1  ;;  %v1171_v21 = vrot.slane %v1152_v5, 4 }
 0x342   : > { %v1123_v22 = vrot.slane %v1122_v8, 2  ;;  %v1154_v23 = vadd.f32 %v1153_v9, %v1149_v61  ;;  %v1135_v24 = vrot.slane %v1134_v11, 2  ;;  %v1166_v25 = vadd.f32 %v1165_v13, %v1151_v63 }
 0x343   : > { %v1129_v26 = vrot.slane %v1128_v16, 2  ;;  %v1160_v27 = vadd.f32 %v1159_v17, %v1150_v3  ;;  %v1141_v28 = vrot.slane %v1140_v20, 2  ;;  %v1172_v29 = vadd.f32 %v1171_v21, %v1152_v5 }
 0x344   : > { %v1124_v31 = vadd.f32 %v1123_v22, %v1122_v8  ;;  %v1155_v32 = vrot.slane %v1154_v23, 2  ;;  %v1136_v34 = vadd.f32 %v1135_v24, %v1134_v11  ;;  %v1167_v35 = vrot.slane %v1166_v25, 2 }
 0x345   : > { %v1130_v36 = vadd.f32 %v1129_v26, %v1128_v16  ;;  %v1161_v37 = vrot.slane %v1160_v27, 2  ;;  %v1142_v30 = vadd.f32 %v1141_v28, %v1140_v20  ;;  %v1173_v33 = vrot.slane %v1172_v29, 2 }
 0x346   : > { %v1125_v38 = vrot.slane %v1124_v31, 1  ;;  %v1156_v39 = vadd.f32 %v1155_v32, %v1154_v23  ;;  %v1137_v40 = vrot.slane %v1136_v34, 1  ;;  %v1168_v41 = vadd.f32 %v1167_v35, %v1166_v25 }
 0x347   : > { %v1131_v42 = vrot.slane %v1130_v36, 1  ;;  %v1162_v43 = vadd.f32 %v1161_v37, %v1160_v27  ;;  %v1143_v44 = vrot.slane %v1142_v30, 1  ;;  %v1174_v45 = vadd.f32 %v1173_v33, %v1172_v29  ;;  %v337_v33 = vld [vmem:[%s5785_s1 + $0x5] sm:$0xf] }
 0x348   : > { %v1126_v46 = vadd.f32 %v1125_v38, %v1124_v31  ;;  %v1157_v47 = vrot.slane %v1156_v39, 1  ;;  %v1138_v48 = vadd.f32 %v1137_v40, %v1136_v34  ;;  %v1169_v49 = vrot.slane %v1168_v41, 1 }
 0x349   : > { %v1132_v53 = vadd.f32 %v1131_v42, %v1130_v36  ;;  %v1163_v57 = vrot.slane %v1162_v43, 1  ;;  %v1144_v60 = vadd.f32 %v1143_v44, %v1142_v30  ;;  %v1175_v61 = vrot.slane %v1174_v45, 1 }
 0x34a   : > { %v1145_v62 = vmul.f32 0.125, %v1126_v46  ;;  %v1158_v63 = vadd.f32 %v1157_v47, %v1156_v39  ;;  %v1147_v2 = vmul.f32 0.125, %v1138_v48  ;;  %v1170_v3 = vadd.f32 %v1169_v49, %v1168_v41 }
 0x34b   : > { %v1146_v4 = vmul.f32 0.125, %v1132_v53  ;;  %v1164_v5 = vadd.f32 %v1163_v57, %v1162_v43  ;;  %v1148_v6 = vmul.f32 0.125, %v1144_v60  ;;  %v1176_v7 = vadd.f32 %v1175_v61, %v1174_v45 }
 0x34c   : > { %v1177_v8 = vmul.f32 0.125, %v1158_v63  ;;  %v1181_v9 = vmul.f32 %v1145_v62, %v1145_v62  ;;  %v1179_v11 = vmul.f32 0.125, %v1170_v3  ;;  %v1183_v13 = vmul.f32 %v1147_v2, %v1147_v2 }
 0x34d   : > { %v1178_v14 = vmul.f32 0.125, %v1164_v5  ;;  %v1182_v15 = vmul.f32 %v1146_v4, %v1146_v4  ;;  %v1180_v16 = vmul.f32 0.125, %v1176_v7  ;;  %v1184_v17 = vmul.f32 %v1148_v6, %v1148_v6 }
 0x34e   : > { %v1185_v20 = vsub.f32 %v1177_v8, %v1181_v9  ;;  %v1187_v21 = vsub.f32 %v1179_v11, %v1183_v13  ;;  %v5590_v39 = vsub.s32 2, %v5518_v10  ;;  %v5593_v40 = vsub.s32 3, %v5518_v10 }
 0x34f   : > { %v1186_v22 = vsub.f32 %v1178_v14, %v1182_v15  ;;  %v1188_v23 = vsub.f32 %v1180_v16, %v1184_v17  ;;  %v1463_v17 = vld [vmem:[#allocation6 + $0x440] sm:$0xff] }
 0x350   : > { %v1189_v24 = vadd.f32 0.8, %v1185_v20  ;;  %v1191_v25 = vadd.f32 0.8, %v1187_v21 }
 0x351   : > { %v1190_v26 = vadd.f32 0.8, %v1186_v22  ;;  %v1192_v27 = vadd.f32 0.8, %v1188_v23  ;;  %v1467_v22 = vld [vmem:[#allocation6 + $0x460] sm:$0xff]  ;;  %v1464_v23 = vld [vmem:[#allocation6 + $0x448] sm:$0xff] }
 0x352   : > { %5156 = vrsqrt.f32 %v1189_v24  ;;  %v1468_v24 = vld [vmem:[#allocation6 + $0x468] sm:$0xff] }
 0x353   : > { %5158 = vrsqrt.f32 %v1191_v25 }
 0x354   : > { %5160 = vrsqrt.f32 %v1190_v26 }
 0x355   : > { %5162 = vrsqrt.f32 %v1192_v27 }
 0x35c   : > { %v5157_v28 = vpop.eup %5156 }
 0x35d   : > { %v5159_v29 = vpop.eup %5158 }
 0x35e   : > { %v5161_v31 = vpop.eup %5160 }
 0x35f   : > { %v5163_v32 = vpop.eup %5162  ;;  %v1201_v34 = vcombine.low %v5157_v28, %v5161_v31  ;;  %v1471_v28 = vld [vmem:[#allocation6 + $0x480] sm:$0xff]  ;;  %v4610_v31 = vcombine.high %v1464_v23, %v1468_v24 }
 0x360   : > { %v1202_v35 = vcombine.low %v5159_v29, %v5163_v32  ;;  %v4608_v29 = vcombine.high %v1463_v17, %v1467_v22  ;;  %v1475_v32 = vld [vmem:[#allocation6 + $0x4a0] sm:$0xff] }
 0x361   : > { %v1209_v36 = vrot.slane %v1201_v34, %v5521_v12  ;;  %v1472_v34 = vld [vmem:[#allocation6 + $0x488] sm:$0xff]  ;;  %v4615_v50 = vcombine.low %v1471_v28, %v1475_v32 }
 0x362   : > { %v1216_v37 = vrot.slane %v1202_v35, %v5521_v12  ;;  %v1476_v35 = vld [vmem:[#allocation6 + $0x4a8] sm:$0xff] }
 0x363   : > { %v4617_v51 = vcombine.low %v1472_v34, %v1476_v35 }
 0x364   : > { %v1217_v30 = vcombine.low %v1209_v36, %v1216_v37  ;;  %v4607_v37 = vcombine.low %v1463_v17, %v1467_v22  ;;  %v1519_v22 = vld [vmem:[#allocation6 + $0x600] sm:$0xff] }
 0x366   : > { %v1224_v38 = vrot.slane %v1217_v30, %v5521_v12  ;;  %v4609_v30 = vcombine.low %v1464_v23, %v1468_v24  ;;  %v1523_v23 = vld [vmem:[#allocation6 + $0x620] sm:$0xff]  ;;  %v1520_v24 = vld [vmem:[#allocation6 + $0x608] sm:$0xff] }
 0x368   : > { %v1226_v41 = vmul.f32 %v1224_v38, %v337_v33  ;;  %v4616_v33 = vcombine.high %v1471_v28, %v1475_v32  ;;  %v4618_v38 = vcombine.high %v1472_v34, %v1476_v35  ;;  %v1527_v34 = vld [vmem:[#allocation6 + $0x640] sm:$0xff] }
 0x369   : > { %v1531_v35 = vld [vmem:[#allocation6 + $0x660] sm:$0xff] }
 0x36a   : > { %v1231_v42 = vrot.slane %v1226_v41, %v5529_v18  ;;  %v1235_v43 = vrot.slane %v1226_v41, %v5532_v19  ;;  %v1239_v44 = vrot.slane %v1226_v41, %v5590_v39  ;;  %v1243_v45 = vrot.slane %v1226_v41, %v5593_v40  ;;  %v1479_v41 = vld [vmem:[#allocation6 + $0x4c0] sm:$0xff] }
 0x36c   : > { %v1251_v46 = vmul.f32 %v1243_v45, %v5571_v1  ;;  %v1252_v47 = vmul.f32 %v1231_v42, %v1145_v62  ;;  %v1253_v48 = vmul.f32 %v1235_v43, %v1146_v4  ;;  %v1254_v49 = vmul.f32 %v1239_v44, %v1147_v2  ;;  %v338_v1 = vld [vmem:[%s5785_s1 + $0x9] sm:$0xf] }
 0x36d   : > { %v1255_v53 = vmul.f32 %v1243_v45, %v1148_v6  ;;  %v1249_v57 = vmul.f32 %v1235_v43, %v5569_v0  ;;  %v1248_v60 = vmul.f32 %v1231_v42, %v5559_v58  ;;  %v1250_v61 = vmul.f32 %v1239_v44, %v5561_v59  ;;  %v1483_v42 = vld [vmem:[#allocation6 + $0x4e0] sm:$0xff]  ;;  %v1480_v43 = vld [vmem:[#allocation6 + $0x4c8] sm:$0xff] }
 0x36e   : > { %v1260_v63 = vcombine.low %v1252_v47, %v1253_v48  ;;  %v1484_v44 = vld [vmem:[#allocation6 + $0x4e8] sm:$0xff]  ;;  %v4624_v52 = vcombine.high %v1479_v41, %v1483_v42  ;;  %v4623_v47 = vcombine.low %v1479_v41, %v1483_v42  ;;  %v4672_v41 = vcombine.high %v1527_v34, %v1531_v35 }
 0x36f   : > { %v1261_v3 = vcombine.low %v1254_v49, %v1255_v53  ;;  %v4626_v54 = vcombine.high %v1480_v43, %v1484_v44  ;;  %v1488_v45 = vld [vmem:[#allocation6 + $0x508] sm:$0xff]  ;;  %v4625_v48 = vcombine.low %v1480_v43, %v1484_v44  ;;  %v1535_v43 = vld [vmem:[#allocation6 + $0x680] sm:$0xff] }
 0x370   : > { %v1268_v5 = vrot.slane %v1260_v63, %v5521_v12  ;;  %v1500_v63 = vld [vmem:[#allocation6 + $0x568] sm:$0xff]  ;;  %v1539_v44 = vld [vmem:[#allocation6 + $0x6a0] sm:$0xff] }
 0x371   : > { %v1275_v7 = vrot.slane %v1261_v3, %v5521_v12 }
 0x373   : > { %v1276_v8 = vcombine.low %v1268_v5, %v1275_v7 }
 0x375   : > { %v1283_v62 = vrot.slane %v1276_v8, %v5521_v12 }
 0x377   : > { %v1285_v2 = vsub.f32 %v338_v1, %v1283_v62  ;;  %v1503_v1 = vld [vmem:[#allocation6 + $0x580] sm:$0xff] }
 0x378   : > { %v1507_v62 = vld [vmem:[#allocation6 + $0x5a0] sm:$0xff] }
 0x379   : > { %v1302_v0 = vrot.slane %v1285_v2, %v5593_v40  ;;  %v1294_v58 = vrot.slane %v1285_v2, %v5532_v19  ;;  %v1290_v59 = vrot.slane %v1285_v2, %v5529_v18  ;;  %v1298_v4 = vrot.slane %v1285_v2, %v5590_v39  ;;  %v1504_v2 = vld [vmem:[#allocation6 + $0x588] sm:$0xff] }
 0x37b   : > { %v1310_v6 = vadd.f32 %v1302_v0, %v1251_v46  ;;  %v1308_v9 = vadd.f32 %v1294_v58, %v1249_v57  ;;  %v1307_v11 = vadd.f32 %v1290_v59, %v1248_v60  ;;  %v5613_v13 = vadd.f32 %v1298_v4, %v1250_v61  ;;  %v1492_v46 = vld [vmem:[#allocation6 + $0x528] sm:$0xff]  ;;  %v1495_v57 = vld [vmem:[#allocation6 + $0x540] sm:$0xff] }
 0x37c   : > { %v4634_v53 = vcombine.high %v1488_v45, %v1492_v46  ;;  %v1499_v60 = vld [vmem:[#allocation6 + $0x560] sm:$0xff]  ;;  %v1496_v61 = vld [vmem:[#allocation6 + $0x548] sm:$0xff]  ;;  %v4633_v5 = vcombine.low %v1488_v45, %v1492_v46  ;;  %v4648_v4 = vcombine.high %v1503_v1, %v1507_v62 }
 0x37d   : > { %vm1312_vm5 = vcmp.gt.f32.partialorder %v1308_v9, 0.0  ;;  %v1316_v14 = vmul.f32 0.2, %v1308_v9  ;;  %vm1311_vm6 = vcmp.gt.f32.partialorder %v1307_v11, 0.0  ;;  %v1315_v15 = vmul.f32 0.2, %v1307_v11 }
 0x37e   : > { %vm1314_vm7 = vcmp.gt.f32.partialorder %v1310_v6, 0.0  ;;  %v1318_v16 = vmul.f32 0.2, %v1310_v6  ;;  %v4640_v7 = vcombine.high %v1495_v57, %v1499_v60  ;;  %v4642_v8 = vcombine.high %v1496_v61, %v1500_v63  ;;  %v1508_v0 = vld [vmem:[#allocation6 + $0x5a8] sm:$0xff]  ;;  %v1543_v45 = vld [vmem:[#allocation6 + $0x6c0] sm:$0xff] }
 0x37f   : > { %v1320_v20 = vsel %vm1312_vm5, %v1308_v9, %v1316_v14  ;;  %v1319_v21 = vsel %vm1311_vm6, %v1307_v11, %v1315_v15  ;;  %v4639_v58 = vcombine.low %v1495_v57, %v1499_v60  ;;  %v4641_v59 = vcombine.low %v1496_v61, %v1500_v63  ;;  %v1511_v9 = vld [vmem:[#allocation6 + $0x5c0] sm:$0xff]  ;;  %v1512_v14 = vld [vmem:[#allocation6 + $0x5c8] sm:$0xff] }
 0x380   : > { %v5615_v25 = vpack.c.bf16 %v1320_v20, %v1320_v20  ;;  %v5617_v26 = vpack.c.bf16 %v1319_v21, %v1319_v21  ;;  %v1322_v27 = vsel %vm1314_vm7, %v1310_v6, %v1318_v16  ;;  %v4650_v6 = vcombine.high %v1504_v2, %v1508_v0  ;;  %v1515_v11 = vld [vmem:[#allocation6 + $0x5e0] sm:$0xff]  ;;  %v1516_v15 = vld [vmem:[#allocation6 + $0x5e8] sm:$0xff] }
 0x381   : > { %v5623_v36 = vpack.c.bf16 %v1322_v27, %v1322_v27  ;;  %v4647_v16 = vcombine.low %v1503_v1, %v1507_v62  ;;  %v4649_v17 = vcombine.low %v1504_v2, %v1508_v0  ;;  %v4656_v20 = vcombine.high %v1511_v9, %v1515_v11  ;;  %v1524_v27 = vld [vmem:[#allocation6 + $0x628] sm:$0xff]  ;;  %v1547_v46 = vld [vmem:[#allocation6 + $0x6e0] sm:$0xff] }
 0x382   : > { %2895 = vmatprep.mubr.bf16.mxu0 %v5615_v25  ;;  %2977 = vmatprep.mubr.bf16.mxu1 %v5615_v25  ;;  %v4658_v21 = vcombine.high %v1512_v14, %v1516_v15  ;;  %v4655_v28 = vcombine.low %v1511_v9, %v1515_v11  ;;  %v4666_v32 = vcombine.high %v1520_v24, %v1524_v27  ;;  %v1551_v61 = vld [vmem:[#allocation6 + $0x700] sm:$0xff]  ;;  %vm1313_vm8 = vcmp.gt.f32.partialorder %v5613_v13, 0.0 }
 0x383   : > { %2896 = vmatmul.mubr.bf16.vlgmr.msra.gmra.mrb[8].mxu0 %v5617_v26  ;;  %2978 = vmatmul.mubr.bf16.vlgmr.msra.gmra.mrb[8].mxu1 %v5617_v26  ;;  %v4688_v57 = vcombine.high %v1543_v45, %v1547_v46  ;;  %v1555_v63 = vld [vmem:[#allocation6 + $0x720] sm:$0xff] }
 0x384   : > { %2905 = vmatpush1.bf16.msra.mxu0 %v4599_v55  ;;  %2987 = vmatpush1.bf16.msra.mxu1 %v4601_v56  ;;  %v1487_v55 = vld [vmem:[#allocation6 + $0x500] sm:$0xff]  ;;  %v4696_v1 = vcombine.high %v1551_v61, %v1555_v63 }
 0x385   : > { %2936 = vmatprep.mubr.bf16.mxu0 %v5623_v36  ;;  %3018 = vmatprep.mubr.bf16.mxu1 %v5623_v36  ;;  %v1491_v56 = vld [vmem:[#allocation6 + $0x520] sm:$0xff] }
 0x386   : > { %2906 = vmatprep.subr.bf16.mxu0 %v4608_v29  ;;  %2988 = vmatprep.subr.bf16.mxu1 %v4610_v31  ;;  %v4632_v49 = vcombine.high %v1487_v55, %v1491_v56  ;;  %v4631_v3 = vcombine.low %v1487_v55, %v1491_v56  ;;  %v4657_v29 = vcombine.low %v1512_v14, %v1516_v15  ;;  %v1559_v2 = vld [vmem:[#allocation6 + $0x740] sm:$0xff] }
 0x387   : > { %v4664_v31 = vcombine.high %v1519_v22, %v1523_v23  ;;  %v4680_v55 = vcombine.high %v1535_v43, %v1539_v44  ;;  %v1563_v0 = vld [vmem:[#allocation6 + $0x760] sm:$0xff] }
 0x388   : > { %2907 = vmatpush1.bf16.msra.mxu0 %v4607_v37  ;;  %2989 = vmatpush1.bf16.msra.mxu1 %v4609_v30  ;;  %v1528_v37 = vld [vmem:[#allocation6 + $0x648] sm:$0xff]  ;;  %v4704_v9 = vcombine.high %v1559_v2, %v1563_v0  ;;  %v1567_v14 = vld [vmem:[#allocation6 + $0x780] sm:$0xff] }
 0x389   : > { %2908 = vmatprep.subr.bf16.mxu0 %v4616_v33  ;;  %2990 = vmatprep.subr.bf16.mxu1 %v4618_v38  ;;  %v1532_v30 = vld [vmem:[#allocation6 + $0x668] sm:$0xff]  ;;  %v4663_v33 = vcombine.low %v1519_v22, %v1523_v23  ;;  %v4665_v38 = vcombine.low %v1520_v24, %v1524_v27  ;;  %v1571_v15 = vld [vmem:[#allocation6 + $0x7a0] sm:$0xff] }
 0x38a   : > { %v4674_v42 = vcombine.high %v1528_v37, %v1532_v30  ;;  %v4712_v22 = vcombine.high %v1567_v14, %v1571_v15  ;;  %v1575_v24 = vld [vmem:[#allocation6 + $0x7c0] sm:$0xff] }
 0x38b   : > { %v1579_v27 = vld [vmem:[#allocation6 + $0x7e0] sm:$0xff] }
 0x38c   : > { %2909 = vmatpush1.bf16.msra.mxu0 %v4615_v50  ;;  %2991 = vmatpush1.bf16.msra.mxu1 %v4617_v51  ;;  %v1536_v50 = vld [vmem:[#allocation6 + $0x688] sm:$0xff] }
 0x38d   : > { %2910 = vmatprep.subr.bf16.mxu0 %v4624_v52  ;;  %2992 = vmatprep.subr.bf16.mxu1 %v4626_v54  ;;  %v1540_v51 = vld [vmem:[#allocation6 + $0x6a8] sm:$0xff]  ;;  %v4671_v52 = vcombine.low %v1527_v34, %v1531_v35  ;;  %v4673_v54 = vcombine.low %v1528_v37, %v1532_v30  ;;  %v4720_v34 = vcombine.high %v1575_v24, %v1579_v27  ;;  %v1329_v37 = vld [vmem:[#allocation6 + $0x10] sm:$0xff]  ;;  %v1317_v30 = vmul.f32 0.2, %v5613_v13 }
 0x38e   : > { %v4682_v56 = vcombine.high %v1536_v50, %v1540_v51 }
 0x390   : > { %2911 = vmatpush1.bf16.msra.mxu0 %v4623_v47  ;;  %2993 = vmatpush1.bf16.msra.mxu1 %v4625_v48  ;;  %v1544_v47 = vld [vmem:[#allocation6 + $0x6c8] sm:$0xff] }
 0x391   : > { %2912 = vmatprep.subr.bf16.mxu0 %v4632_v49  ;;  %2994 = vmatprep.subr.bf16.mxu1 %v4634_v53  ;;  %v1548_v48 = vld [vmem:[#allocation6 + $0x6e8] sm:$0xff]  ;;  %v4679_v49 = vcombine.low %v1535_v43, %v1539_v44  ;;  %v4681_v53 = vcombine.low %v1536_v50, %v1540_v51  ;;  %v1321_v51 = vsel %vm1313_vm8, %v5613_v13, %v1317_v30  ;;  %v1346_v13 = vld [vmem:[#allocation6 + $0x98] sm:$0xff] }
 0x392   : > { %v4690_v60 = vcombine.high %v1544_v47, %v1548_v48 }
 0x394   : > { %2913 = vmatpush1.bf16.msra.mxu0 %v4631_v3  ;;  %2995 = vmatpush1.bf16.msra.mxu1 %v4633_v5  ;;  %v1552_v3 = vld [vmem:[#allocation6 + $0x708] sm:$0xff] }
 0x395   : > { %2914 = vmatprep.subr.bf16.mxu0 %v4640_v7  ;;  %2996 = vmatprep.subr.bf16.mxu1 %v4642_v8  ;;  %v1556_v5 = vld [vmem:[#allocation6 + $0x728] sm:$0xff]  ;;  %v4687_v7 = vcombine.low %v1543_v45, %v1547_v46  ;;  %v4689_v8 = vcombine.low %v1544_v47, %v1548_v48  ;;  %v5636_v46 = vpack.c.bf16 %v1321_v51, %v1321_v51 }
 0x396   : > { %v4698_v62 = vcombine.high %v1552_v3, %v1556_v5 }
 0x398   : > { %2915 = vmatpush1.bf16.msra.mxu0 %v4639_v58  ;;  %2997 = vmatpush1.bf16.msra.mxu1 %v4641_v59  ;;  %v1560_v58 = vld [vmem:[#allocation6 + $0x748] sm:$0xff] }
 0x399   : > { %2916 = vmatprep.subr.bf16.mxu0 %v4648_v4  ;;  %2998 = vmatprep.subr.bf16.mxu1 %v4650_v6  ;;  %v1564_v59 = vld [vmem:[#allocation6 + $0x768] sm:$0xff]  ;;  %v4695_v4 = vcombine.low %v1551_v61, %v1555_v63  ;;  %v4697_v6 = vcombine.low %v1552_v3, %v1556_v5 }
 0x39a   : > { %v4706_v11 = vcombine.high %v1560_v58, %v1564_v59 }
 0x39c   : > { %2917 = vmatpush1.bf16.msra.mxu0 %v4647_v16  ;;  %2999 = vmatpush1.bf16.msra.mxu1 %v4649_v17  ;;  %v1568_v16 = vld [vmem:[#allocation6 + $0x788] sm:$0xff] }
 0x39d   : > { %2918 = vmatprep.subr.bf16.mxu0 %v4656_v20  ;;  %3000 = vmatprep.subr.bf16.mxu1 %v4658_v21  ;;  %v1572_v17 = vld [vmem:[#allocation6 + $0x7a8] sm:$0xff]  ;;  %v4703_v20 = vcombine.low %v1559_v2, %v1563_v0  ;;  %v4705_v21 = vcombine.low %v1560_v58, %v1564_v59 }
 0x39e   : > { %v4714_v23 = vcombine.high %v1568_v16, %v1572_v17 }
 0x3a0   : > { %2919 = vmatpush1.bf16.msra.mxu0 %v4655_v28  ;;  %3001 = vmatpush1.bf16.msra.mxu1 %v4657_v29  ;;  %v1576_v28 = vld [vmem:[#allocation6 + $0x7c8] sm:$0xff] }
 0x3a1   : > { %2920 = vmatprep.subr.bf16.mxu0 %v4664_v31  ;;  %3002 = vmatprep.subr.bf16.mxu1 %v4666_v32  ;;  %v1580_v29 = vld [vmem:[#allocation6 + $0x7e8] sm:$0xff]  ;;  %v4711_v31 = vcombine.low %v1567_v14, %v1571_v15  ;;  %v4713_v32 = vcombine.low %v1568_v16, %v1572_v17  ;;  %v1369_v17 = vld [vmem:[#allocation6 + $0x150] sm:$0xff] }
 0x3a2   : > { %v4722_v35 = vcombine.high %v1576_v28, %v1580_v29  ;;  %v4721_v43 = vcombine.low %v1576_v28, %v1580_v29  ;;  %v1377_v29 = vld [vmem:[#allocation6 + $0x190] sm:$0xff] }
 0x3a4   : > { %2921 = vmatpush1.bf16.msra.mxu0 %v4663_v33  ;;  %3003 = vmatpush1.bf16.msra.mxu1 %v4665_v38  ;;  %v1333_v33 = vld [vmem:[#allocation6 + $0x30] sm:$0xff]  ;;  %v1330_v38 = vld [vmem:[#allocation6 + $0x18] sm:$0xff] }
 0x3a5   : > { %2922 = vmatprep.subr.bf16.mxu0 %v4672_v41  ;;  %3004 = vmatprep.subr.bf16.mxu1 %v4674_v42  ;;  %v1334_v41 = vld [vmem:[#allocation6 + $0x38] sm:$0xff]  ;;  %v4719_v42 = vcombine.low %v1575_v24, %v1579_v27  ;;  %v4476_v44 = vcombine.high %v1329_v37, %v1333_v33  ;;  %v4475_v45 = vcombine.low %v1329_v37, %v1333_v33 }
 0x3a6   : > { %v4478_v50 = vcombine.high %v1330_v38, %v1334_v41  ;;  %v4477_v47 = vcombine.low %v1330_v38, %v1334_v41  ;;  %v1385_v38 = vld [vmem:[#allocation6 + $0x1d0] sm:$0xff] }
 0x3a7   : > { %v1389_v41 = vld [vmem:[#allocation6 + $0x1f0] sm:$0xff] }
 0x3a8   : > { %2923 = vmatpush1.bf16.msra.mxu0 %v4671_v52  ;;  %3005 = vmatpush1.bf16.msra.mxu1 %v4673_v54  ;;  %v1337_v52 = vld [vmem:[#allocation6 + $0x50] sm:$0xff]  ;;  %v4532_v51 = vcombine.high %v1385_v38, %v1389_v41 }
 0x3a9   : > { %2924 = vmatprep.subr.bf16.mxu0 %v4680_v55  ;;  %3006 = vmatprep.subr.bf16.mxu1 %v4682_v56  ;;  %v1341_v54 = vld [vmem:[#allocation6 + $0x70] sm:$0xff]  ;;  %v1338_v55 = vld [vmem:[#allocation6 + $0x58] sm:$0xff] }
 0x3aa   : > { %v1342_v56 = vld [vmem:[#allocation6 + $0x78] sm:$0xff]  ;;  %v4484_v48 = vcombine.high %v1337_v52, %v1341_v54  ;;  %v4483_v61 = vcombine.low %v1337_v52, %v1341_v54  ;;  %v1393_v54 = vld [vmem:[#allocation6 + $0x210] sm:$0xff] }
 0x3ab   : > { %v4485_v63 = vcombine.low %v1338_v55, %v1342_v56 }
 0x3ac   : > { %2925 = vmatpush1.bf16.msra.mxu0 %v4679_v49  ;;  %3007 = vmatpush1.bf16.msra.mxu1 %v4681_v53  ;;  %v4486_v49 = vcombine.high %v1338_v55, %v1342_v56  ;;  %v1345_v53 = vld [vmem:[#allocation6 + $0x90] sm:$0xff]  ;;  %v1394_v56 = vld [vmem:[#allocation6 + $0x218] sm:$0xff] }
 0x3ad   : > { %2926 = vmatprep.subr.bf16.mxu0 %v4688_v57  ;;  %3008 = vmatprep.subr.bf16.mxu1 %v4690_v60  ;;  %v1349_v57 = vld [vmem:[#allocation6 + $0xb0] sm:$0xff]  ;;  %v1350_v60 = vld [vmem:[#allocation6 + $0xb8] sm:$0xff] }
 0x3ae   : > { %v4492_v3 = vcombine.high %v1345_v53, %v1349_v57  ;;  %v4494_v5 = vcombine.high %v1346_v13, %v1350_v60  ;;  %v4491_v2 = vcombine.low %v1345_v53, %v1349_v57  ;;  %v4493_v0 = vcombine.low %v1346_v13, %v1350_v60  ;;  %v1397_v55 = vld [vmem:[#allocation6 + $0x230] sm:$0xff]  ;;  %v1402_v60 = vld [vmem:[#allocation6 + $0x258] sm:$0xff] }
 0x3af   : > { %v1401_v57 = vld [vmem:[#allocation6 + $0x250] sm:$0xff] }
 0x3b0   : > { %2927 = vmatpush1.bf16.msra.mxu0 %v4687_v7  ;;  %3009 = vmatpush1.bf16.msra.mxu1 %v4689_v8  ;;  %v1353_v7 = vld [vmem:[#allocation6 + $0xd0] sm:$0xff] }
 0x3b1   : > { %2928 = vmatprep.subr.bf16.mxu0 %v4696_v1  ;;  %3010 = vmatprep.subr.bf16.mxu1 %v4698_v62  ;;  %v1357_v8 = vld [vmem:[#allocation6 + $0xf0] sm:$0xff]  ;;  %v1354_v1 = vld [vmem:[#allocation6 + $0xd8] sm:$0xff] }
 0x3b2   : > { %v1358_v62 = vld [vmem:[#allocation6 + $0xf8] sm:$0xff]  ;;  %v4500_v58 = vcombine.high %v1353_v7, %v1357_v8  ;;  %v1405_v13 = vld [vmem:[#allocation6 + $0x270] sm:$0xff] }
 0x3b3   : > { %v4502_v59 = vcombine.high %v1354_v1, %v1358_v62  ;;  %v4501_v14 = vcombine.low %v1354_v1, %v1358_v62  ;;  %v1413_v1 = vld [vmem:[#allocation6 + $0x2b0] sm:$0xff]  ;;  %v1410_v62 = vld [vmem:[#allocation6 + $0x298] sm:$0xff] }
 0x3b4   : > { %2929 = vmatpush1.bf16.msra.mxu0 %v4695_v4  ;;  %3011 = vmatpush1.bf16.msra.mxu1 %v4697_v6  ;;  %v1361_v4 = vld [vmem:[#allocation6 + $0x110] sm:$0xff] }
 0x3b5   : > { %2930 = vmatprep.subr.bf16.mxu0 %v4704_v9  ;;  %3012 = vmatprep.subr.bf16.mxu1 %v4706_v11  ;;  %v1365_v6 = vld [vmem:[#allocation6 + $0x130] sm:$0xff]  ;;  %v1366_v9 = vld [vmem:[#allocation6 + $0x138] sm:$0xff]  ;;  %v4499_v11 = vcombine.low %v1353_v7, %v1357_v8 }
 0x3b6   : > { %v4508_v15 = vcombine.high %v1361_v4, %v1365_v6  ;;  %v1409_v8 = vld [vmem:[#allocation6 + $0x290] sm:$0xff] }
 0x3b8   : > { %2931 = vmatpush1.bf16.msra.mxu0 %v4703_v20  ;;  %3013 = vmatpush1.bf16.msra.mxu1 %v4705_v21  ;;  %v1373_v20 = vld [vmem:[#allocation6 + $0x170] sm:$0xff]  ;;  %v1370_v21 = vld [vmem:[#allocation6 + $0x158] sm:$0xff] }
 0x3b9   : > { %2932 = vmatprep.subr.bf16.mxu0 %v4712_v22  ;;  %3014 = vmatprep.subr.bf16.mxu1 %v4714_v23  ;;  %v1374_v22 = vld [vmem:[#allocation6 + $0x178] sm:$0xff]  ;;  %v4507_v23 = vcombine.low %v1361_v4, %v1365_v6  ;;  %v4516_v27 = vcombine.high %v1369_v17, %v1373_v20  ;;  %v1417_v6 = vld [vmem:[#allocation6 + $0x2d0] sm:$0xff] }
 0x3ba   : > { %v4518_v28 = vcombine.high %v1370_v21, %v1374_v22  ;;  %v4517_v37 = vcombine.low %v1370_v21, %v1374_v22  ;;  %v1429_v21 = vld [vmem:[#allocation6 + $0x330] sm:$0xff]  ;;  %v1426_v22 = vld [vmem:[#allocation6 + $0x318] sm:$0xff] }
 0x3bc   : > { %2933 = vmatpush1.bf16.msra.mxu0 %v4711_v31  ;;  %3015 = vmatpush1.bf16.msra.mxu1 %v4713_v32  ;;  %v1381_v31 = vld [vmem:[#allocation6 + $0x1b0] sm:$0xff]  ;;  %v1378_v32 = vld [vmem:[#allocation6 + $0x198] sm:$0xff] }
 0x3bd   : > { %2934 = vmatprep.subr.bf16.mxu0 %v4720_v34  ;;  %3016 = vmatprep.subr.bf16.mxu1 %v4722_v35  ;;  %v1382_v34 = vld [vmem:[#allocation6 + $0x1b8] sm:$0xff]  ;;  %v4515_v35 = vcombine.low %v1369_v17, %v1373_v20  ;;  %v4524_v30 = vcombine.high %v1377_v29, %v1381_v31  ;;  %v1425_v20 = vld [vmem:[#allocation6 + $0x310] sm:$0xff] }
 0x3be   : > { %v4526_v33 = vcombine.high %v1378_v32, %v1382_v34 }
 0x3c0   : > { %2935 = vmatpush1.bf16.msra.mxu0 %v4719_v42  ;;  %3017 = vmatpush1.bf16.msra.mxu1 %v4721_v43  ;;  %v1386_v42 = vld [vmem:[#allocation6 + $0x1d8] sm:$0xff] }
 0x3c1   : > { %3027 = vmatprep.subr.bf16.mxu0 %v4476_v44  ;;  %3109 = vmatprep.subr.bf16.mxu1 %v4478_v50  ;;  %v1390_v43 = vld [vmem:[#allocation6 + $0x1f8] sm:$0xff]  ;;  %v4523_v44 = vcombine.low %v1377_v29, %v1381_v31  ;;  %v4525_v50 = vcombine.low %v1378_v32, %v1382_v34  ;;  %v1433_v31 = vld [vmem:[#allocation6 + $0x350] sm:$0xff] }
 0x3c2   : > { %v4534_v52 = vcombine.high %v1386_v42, %v1390_v43  ;;  %v1437_v32 = vld [vmem:[#allocation6 + $0x370] sm:$0xff]  ;;  %v1434_v34 = vld [vmem:[#allocation6 + $0x358] sm:$0xff] }
 0x3c3   : > { %2937 = vmatmul.mubr.bf16.vlgmr.msra.gmra.mrb[8].mxu0 %v5636_v46  ;;  %3019 = vmatmul.mubr.bf16.vlgmr.msra.gmra.mrb[8].mxu1 %v5636_v46 }
 0x3c4   : > { %3028 = vmatpush1.bf16.msra.mxu0 %v4475_v45  ;;  %3059 = vmatprep.mubr.bf16.mxu0 %v5615_v25  ;;  %v1398_v45 = vld [vmem:[#allocation6 + $0x238] sm:$0xff] }
 0x3c5   : > { %3110 = vmatpush1.bf16.msra.mxu1 %v4477_v47  ;;  %3141 = vmatprep.mubr.bf16.mxu1 %v5615_v25  ;;  %v1362_v25 = vld [vmem:[#allocation6 + $0x118] sm:$0xff]  ;;  %v4531_v47 = vcombine.low %v1385_v38, %v1389_v41  ;;  %v4542_v53 = vcombine.high %v1394_v56, %v1398_v45  ;;  %v1441_v41 = vld [vmem:[#allocation6 + $0x390] sm:$0xff] }
 0x3c6   : > { %3029 = vmatprep.subr.bf16.mxu0 %v4484_v48  ;;  %3111 = vmatprep.subr.bf16.mxu1 %v4486_v49  ;;  %v4510_v16 = vcombine.high %v1362_v25, %v1366_v9  ;;  %v4509_v24 = vcombine.low %v1362_v25, %v1366_v9  ;;  %v4533_v48 = vcombine.low %v1386_v42, %v1390_v43  ;;  %v1421_v25 = vld [vmem:[#allocation6 + $0x2f0] sm:$0xff]  ;;  %v1418_v9 = vld [vmem:[#allocation6 + $0x2d8] sm:$0xff] }
 0x3c7   : > { %v4540_v49 = vcombine.high %v1393_v54, %v1397_v55  ;;  %v1445_v42 = vld [vmem:[#allocation6 + $0x3b0] sm:$0xff]  ;;  %v1442_v43 = vld [vmem:[#allocation6 + $0x398] sm:$0xff] }
 0x3c8   : > { %3030 = vmatpush1.bf16.msra.mxu0 %v4483_v61  ;;  %v1406_v61 = vld [vmem:[#allocation6 + $0x278] sm:$0xff] }
 0x3c9   : > { %3112 = vmatpush1.bf16.msra.mxu1 %v4485_v63  ;;  %3031 = vmatprep.subr.bf16.mxu0 %v4492_v3  ;;  %v4539_v63 = vcombine.low %v1393_v54, %v1397_v55  ;;  %v4541_v3 = vcombine.low %v1394_v56, %v1398_v45  ;;  %v4550_v7 = vcombine.high %v1402_v60, %v1406_v61  ;;  %v1449_v55 = vld [vmem:[#allocation6 + $0x3d0] sm:$0xff]  ;;  %v1450_v45 = vld [vmem:[#allocation6 + $0x3d8] sm:$0xff] }
 0x3ca   : > { %3113 = vmatprep.subr.bf16.mxu1 %v4494_v5  ;;  %v4548_v5 = vcombine.high %v1401_v57, %v1405_v13  ;;  %v1453_v56 = vld [vmem:[#allocation6 + $0x3f0] sm:$0xff] }
 0x3cc   : > { %3032 = vmatpush1.bf16.msra.mxu0 %v4491_v2  ;;  %v1414_v2 = vld [vmem:[#allocation6 + $0x2b8] sm:$0xff] }
 0x3cd   : > { %3114 = vmatpush1.bf16.msra.mxu1 %v4493_v0  ;;  %3033 = vmatprep.subr.bf16.mxu0 %v4500_v58  ;;  %v4547_v0 = vcombine.low %v1401_v57, %v1405_v13  ;;  %v4549_v58 = vcombine.low %v1402_v60, %v1406_v61  ;;  %v4558_v4 = vcombine.high %v1410_v62, %v1414_v2  ;;  %v1457_v13 = vld [vmem:[#allocation6 + $0x410] sm:$0xff]  ;;  %v1458_v61 = vld [vmem:[#allocation6 + $0x418] sm:$0xff] }
 0x3ce   : > { %3115 = vmatprep.subr.bf16.mxu1 %v4502_v59  ;;  %v4556_v59 = vcombine.high %v1409_v8, %v1413_v1  ;;  %v1461_v60 = vld [vmem:[#allocation6 + $0x430] sm:$0xff] }
 0x3d0   : > { %3034 = vmatpush1.bf16.msra.mxu0 %v4499_v11  ;;  %v1422_v11 = vld [vmem:[#allocation6 + $0x2f8] sm:$0xff] }
 0x3d1   : > { %3116 = vmatpush1.bf16.msra.mxu1 %v4501_v14  ;;  %3035 = vmatprep.subr.bf16.mxu0 %v4508_v15  ;;  %v4555_v14 = vcombine.low %v1409_v8, %v1413_v1  ;;  %v4557_v15 = vcombine.low %v1410_v62, %v1414_v2  ;;  %v4566_v17 = vcombine.high %v1418_v9, %v1422_v11  ;;  %v1465_v1 = vld [vmem:[#allocation6 + $0x450] sm:$0xff] }
 0x3d2   : > { %3117 = vmatprep.subr.bf16.mxu1 %v4510_v16  ;;  %v4564_v16 = vcombine.high %v1417_v6, %v1421_v25  ;;  %v1469_v62 = vld [vmem:[#allocation6 + $0x470] sm:$0xff]  ;;  %v4603_v2 = vcombine.low %v1457_v13, %v1461_v60 }
 0x3d4   : > { %3036 = vmatpush1.bf16.msra.mxu0 %v4507_v23  ;;  %v1430_v23 = vld [vmem:[#allocation6 + $0x338] sm:$0xff] }
 0x3d5   : > { %3118 = vmatpush1.bf16.msra.mxu1 %v4509_v24  ;;  %3037 = vmatprep.subr.bf16.mxu0 %v4516_v27  ;;  %v4563_v24 = vcombine.low %v1417_v6, %v1421_v25  ;;  %v4565_v27 = vcombine.low %v1418_v9, %v1422_v11  ;;  %v4574_v29 = vcombine.high %v1426_v22, %v1430_v23  ;;  %v1473_v6 = vld [vmem:[#allocation6 + $0x490] sm:$0xff]  ;;  %v1474_v11 = vld [vmem:[#allocation6 + $0x498] sm:$0xff] }
 0x3d6   : > { %3119 = vmatprep.subr.bf16.mxu1 %v4518_v28  ;;  %v4572_v28 = vcombine.high %v1425_v20, %v1429_v21  ;;  %v1477_v25 = vld [vmem:[#allocation6 + $0x4b0] sm:$0xff] }
 0x3d8   : > { %3038 = vmatpush1.bf16.msra.mxu0 %v4515_v35  ;;  %v1438_v35 = vld [vmem:[#allocation6 + $0x378] sm:$0xff] }
 0x3d9   : > { %3120 = vmatpush1.bf16.msra.mxu1 %v4517_v37  ;;  %3039 = vmatprep.subr.bf16.mxu0 %v4524_v30  ;;  %v4571_v37 = vcombine.low %v1425_v20, %v1429_v21  ;;  %v4573_v30 = vcombine.low %v1426_v22, %v1430_v23  ;;  %v4582_v38 = vcombine.high %v1434_v34, %v1438_v35  ;;  %v1481_v21 = vld [vmem:[#allocation6 + $0x4d0] sm:$0xff]  ;;  %v1482_v23 = vld [vmem:[#allocation6 + $0x4d8] sm:$0xff] }
 0x3da   : > { %3121 = vmatprep.subr.bf16.mxu1 %v4526_v33  ;;  %v4580_v33 = vcombine.high %v1433_v31, %v1437_v32  ;;  %v1485_v22 = vld [vmem:[#allocation6 + $0x4f0] sm:$0xff] }
 0x3dc   : > { %3040 = vmatpush1.bf16.msra.mxu0 %v4523_v44  ;;  %v1446_v44 = vld [vmem:[#allocation6 + $0x3b8] sm:$0xff] }
 0x3dd   : > { %3122 = vmatpush1.bf16.msra.mxu1 %v4525_v50  ;;  %3041 = vmatprep.subr.bf16.mxu0 %v4532_v51  ;;  %v4579_v50 = vcombine.low %v1433_v31, %v1437_v32  ;;  %v4581_v51 = vcombine.low %v1434_v34, %v1438_v35  ;;  %v4590_v54 = vcombine.high %v1442_v43, %v1446_v44  ;;  %v1489_v31 = vld [vmem:[#allocation6 + $0x510] sm:$0xff]  ;;  %v1490_v34 = vld [vmem:[#allocation6 + $0x518] sm:$0xff] }
 0x3de   : > { %3123 = vmatprep.subr.bf16.mxu1 %v4534_v52  ;;  %v4588_v52 = vcombine.high %v1441_v41, %v1445_v42  ;;  %v1493_v32 = vld [vmem:[#allocation6 + $0x530] sm:$0xff]  ;;  %v1494_v35 = vld [vmem:[#allocation6 + $0x538] sm:$0xff] }
 0x3e0   : > { %3042 = vmatpush1.bf16.msra.mxu0 %v4531_v47  ;;  %v1454_v47 = vld [vmem:[#allocation6 + $0x3f8] sm:$0xff] }
 0x3e1   : > { %3124 = vmatpush1.bf16.msra.mxu1 %v4533_v48  ;;  %3043 = vmatprep.subr.bf16.mxu0 %v4540_v49  ;;  %v4587_v48 = vcombine.low %v1441_v41, %v1445_v42  ;;  %v4589_v49 = vcombine.low %v1442_v43, %v1446_v44  ;;  %v4598_v57 = vcombine.high %v1450_v45, %v1454_v47  ;;  %v1501_v41 = vld [vmem:[#allocation6 + $0x570] sm:$0xff]  ;;  %v1498_v42 = vld [vmem:[#allocation6 + $0x558] sm:$0xff] }
 0x3e2   : > { %3125 = vmatprep.subr.bf16.mxu1 %v4542_v53  ;;  %v4596_v53 = vcombine.high %v1449_v55, %v1453_v56  ;;  %v1502_v43 = vld [vmem:[#allocation6 + $0x578] sm:$0xff]  ;;  %v4635_v44 = vcombine.low %v1489_v31, %v1493_v32 }
 0x3e4   : > { %3044 = vmatpush1.bf16.msra.mxu0 %v4539_v63  ;;  %v1462_v63 = vld [vmem:[#allocation6 + $0x438] sm:$0xff] }
 0x3e5   : > { %3126 = vmatpush1.bf16.msra.mxu1 %v4541_v3  ;;  %3045 = vmatprep.subr.bf16.mxu0 %v4548_v5  ;;  %v4595_v3 = vcombine.low %v1449_v55, %v1453_v56  ;;  %v4597_v5 = vcombine.low %v1450_v45, %v1454_v47  ;;  %v4606_v8 = vcombine.high %v1458_v61, %v1462_v63  ;;  %v1509_v55 = vld [vmem:[#allocation6 + $0x5b0] sm:$0xff]  ;;  %v1506_v56 = vld [vmem:[#allocation6 + $0x598] sm:$0xff] }
 0x3e6   : > { %3127 = vmatprep.subr.bf16.mxu1 %v4550_v7  ;;  %v4604_v7 = vcombine.high %v1457_v13, %v1461_v60  ;;  %v1510_v45 = vld [vmem:[#allocation6 + $0x5b8] sm:$0xff]  ;;  %v1517_v13 = vld [vmem:[#allocation6 + $0x5f0] sm:$0xff] }
 0x3e7   : > { %v1514_v60 = vld [vmem:[#allocation6 + $0x5d8] sm:$0xff] }
 0x3e8   : > { %3046 = vmatpush1.bf16.msra.mxu0 %v4547_v0  ;;  %v1466_v0 = vld [vmem:[#allocation6 + $0x458] sm:$0xff] }
 0x3e9   : > { %3128 = vmatpush1.bf16.msra.mxu1 %v4549_v58  ;;  %3047 = vmatprep.subr.bf16.mxu0 %v4556_v59  ;;  %v1470_v58 = vld [vmem:[#allocation6 + $0x478] sm:$0xff]  ;;  %v4605_v59 = vcombine.low %v1458_v61, %v1462_v63 }
 0x3ea   : > { %3129 = vmatprep.subr.bf16.mxu1 %v4558_v4  ;;  %v4612_v4 = vcombine.high %v1465_v1, %v1469_v62  ;;  %v4614_v9 = vcombine.high %v1466_v0, %v1470_v58  ;;  %v1518_v61 = vld [vmem:[#allocation6 + $0x5f8] sm:$0xff] }
 0x3ec   : > { %3048 = vmatpush1.bf16.msra.mxu0 %v4555_v14  ;;  %v1478_v14 = vld [vmem:[#allocation6 + $0x4b8] sm:$0xff] }
 0x3ed   : > { %3130 = vmatpush1.bf16.msra.mxu1 %v4557_v15  ;;  %3049 = vmatprep.subr.bf16.mxu0 %v4564_v16  ;;  %v4611_v15 = vcombine.low %v1465_v1, %v1469_v62  ;;  %v4613_v16 = vcombine.low %v1466_v0, %v1470_v58  ;;  %v4622_v20 = vcombine.high %v1474_v11, %v1478_v14  ;;  %v1525_v1 = vld [vmem:[#allocation6 + $0x630] sm:$0xff]  ;;  %v1522_v62 = vld [vmem:[#allocation6 + $0x618] sm:$0xff] }
 0x3ee   : > { %3131 = vmatprep.subr.bf16.mxu1 %v4566_v17  ;;  %v4620_v17 = vcombine.high %v1473_v6, %v1477_v25  ;;  %v4661_v58 = vcombine.low %v1514_v60, %v1518_v61 }
 0x3f0   : > { %3050 = vmatpush1.bf16.msra.mxu0 %v4563_v24  ;;  %v1486_v24 = vld [vmem:[#allocation6 + $0x4f8] sm:$0xff] }
 0x3f1   : > { %3132 = vmatpush1.bf16.msra.mxu1 %v4565_v27  ;;  %3051 = vmatprep.subr.bf16.mxu0 %v4572_v28  ;;  %v4619_v27 = vcombine.low %v1473_v6, %v1477_v25  ;;  %v4628_v28 = vcombine.high %v1481_v21, %v1485_v22  ;;  %v1529_v6 = vld [vmem:[#allocation6 + $0x650] sm:$0xff] }
 0x3f2   : > { %3133 = vmatprep.subr.bf16.mxu1 %v4574_v29  ;;  %v4630_v29 = vcombine.high %v1482_v23, %v1486_v24  ;;  %v1533_v25 = vld [vmem:[#allocation6 + $0x670] sm:$0xff] }
 0x3f4   : > { %3052 = vmatpush1.bf16.msra.mxu0 %v4571_v37  ;;  %v4629_v37 = vcombine.low %v1482_v23, %v1486_v24  ;;  %v1542_v23 = vld [vmem:[#allocation6 + $0x6b8] sm:$0xff]  ;;  %v4675_v24 = vcombine.low %v1529_v6, %v1533_v25 }
 0x3f5   : > { %3134 = vmatpush1.bf16.msra.mxu1 %v4573_v30  ;;  %3053 = vmatprep.subr.bf16.mxu0 %v4580_v33  ;;  %v4636_v30 = vcombine.high %v1489_v31, %v1493_v32  ;;  %v4638_v33 = vcombine.high %v1490_v34, %v1494_v35  ;;  %v1549_v31 = vld [vmem:[#allocation6 + $0x6f0] sm:$0xff]  ;;  %v1546_v32 = vld [vmem:[#allocation6 + $0x6d8] sm:$0xff] }
 0x3f6   : > { %3135 = vmatprep.subr.bf16.mxu1 %v4582_v38  ;;  %v1497_v38 = vld [vmem:[#allocation6 + $0x550] sm:$0xff] }
 0x3f7   : > { %v4643_v47 = vcombine.low %v1497_v38, %v1501_v41 }
 0x3f8   : > { %3054 = vmatpush1.bf16.msra.mxu0 %v4579_v50  ;;  %v4637_v50 = vcombine.low %v1490_v34, %v1494_v35  ;;  %v1550_v34 = vld [vmem:[#allocation6 + $0x6f8] sm:$0xff] }
 0x3f9   : > { %3136 = vmatpush1.bf16.msra.mxu1 %v4581_v51  ;;  %3055 = vmatprep.subr.bf16.mxu0 %v4588_v52  ;;  %v4644_v51 = vcombine.high %v1497_v38, %v1501_v41  ;;  %v4646_v52 = vcombine.high %v1498_v42, %v1502_v43  ;;  %v1557_v38 = vld [vmem:[#allocation6 + $0x730] sm:$0xff]  ;;  %v1554_v41 = vld [vmem:[#allocation6 + $0x718] sm:$0xff] }
 0x3fa   : > { %3137 = vmatprep.subr.bf16.mxu1 %v4590_v54  ;;  %v1505_v54 = vld [vmem:[#allocation6 + $0x590] sm:$0xff] }
 0x3fb   : > { %v4651_v63 = vcombine.low %v1505_v54, %v1509_v55 }
 0x3fc   : > { %3056 = vmatpush1.bf16.msra.mxu0 %v4587_v48  ;;  %v4645_v48 = vcombine.low %v1498_v42, %v1502_v43  ;;  %v1558_v42 = vld [vmem:[#allocation6 + $0x738] sm:$0xff] }
 0x3fd   : > { %3138 = vmatpush1.bf16.msra.mxu1 %v4589_v49  ;;  %3057 = vmatprep.subr.bf16.mxu0 %v4596_v53  ;;  %v4652_v49 = vcombine.high %v1505_v54, %v1509_v55  ;;  %v4654_v53 = vcombine.high %v1506_v56, %v1510_v45  ;;  %v1565_v54 = vld [vmem:[#allocation6 + $0x770] sm:$0xff]  ;;  %v1562_v55 = vld [vmem:[#allocation6 + $0x758] sm:$0xff] }
 0x3fe   : > { %3139 = vmatprep.subr.bf16.mxu1 %v4598_v57  ;;  %v1513_v57 = vld [vmem:[#allocation6 + $0x5d0] sm:$0xff] }
 0x3ff   : > { %v4659_v0 = vcombine.low %v1513_v57, %v1517_v13 }
 0x400   : > { %3058 = vmatpush1.bf16.msra.mxu0 %v4595_v3  ;;  %v4653_v3 = vcombine.low %v1506_v56, %v1510_v45  ;;  %v1566_v56 = vld [vmem:[#allocation6 + $0x778] sm:$0xff] }
 0x401   : > { %3140 = vmatpush1.bf16.msra.mxu1 %v4597_v5  ;;  %3068 = vmatprep.subr.bf16.mxu0 %v4604_v7  ;;  %v4660_v5 = vcombine.high %v1513_v57, %v1517_v13  ;;  %v4662_v7 = vcombine.high %v1514_v60, %v1518_v61  ;;  %v1573_v57 = vld [vmem:[#allocation6 + $0x7b0] sm:$0xff]  ;;  %v1570_v13 = vld [vmem:[#allocation6 + $0x798] sm:$0xff] }
 0x402   : > { %3150 = vmatprep.subr.bf16.mxu1 %v4606_v8  ;;  %v1521_v8 = vld [vmem:[#allocation6 + $0x610] sm:$0xff]  ;;  %v1574_v60 = vld [vmem:[#allocation6 + $0x7b8] sm:$0xff] }
 0x403   : > { %3060 = vmatmul.mubr.bf16.vlgmr.msra.gmra.mrb[12].mxu0 %v5617_v26 }
 0x404   : > { %3142 = vmatmul.mubr.bf16.vlgmr.msra.gmra.mrb[12].mxu1 %v5617_v26  ;;  %3069 = vmatpush1.bf16.msra.mxu0 %v4603_v2  ;;  %v4621_v26 = vcombine.low %v1474_v11, %v1478_v14  ;;  %v1526_v2 = vld [vmem:[#allocation6 + $0x638] sm:$0xff]  ;;  %v4667_v14 = vcombine.low %v1521_v8, %v1525_v1 }
 0x405   : > { %3100 = vmatprep.mubr.bf16.mxu0 %v5623_v36  ;;  %3151 = vmatpush1.bf16.msra.mxu1 %v4605_v59  ;;  %v4668_v59 = vcombine.high %v1521_v8, %v1525_v1  ;;  %v1534_v11 = vld [vmem:[#allocation6 + $0x678] sm:$0xff]  ;;  %v1581_v8 = vld [vmem:[#allocation6 + $0x7f0] sm:$0xff] }
 0x406   : > { %3182 = vmatprep.mubr.bf16.mxu1 %v5623_v36  ;;  %3070 = vmatprep.subr.bf16.mxu0 %v4612_v4  ;;  %v4627_v36 = vcombine.low %v1481_v21, %v1485_v22  ;;  %v4670_v4 = vcombine.high %v1522_v62, %v1526_v2  ;;  %v1541_v21 = vld [vmem:[#allocation6 + $0x6b0] sm:$0xff]  ;;  %v1538_v22 = vld [vmem:[#allocation6 + $0x698] sm:$0xff] }
 0x407   : > { %3152 = vmatprep.subr.bf16.mxu1 %v4614_v9  ;;  %v1530_v9 = vld [vmem:[#allocation6 + $0x658] sm:$0xff] }
 0x408   : > { %3071 = vmatpush1.bf16.msra.mxu0 %v4611_v15  ;;  %v4669_v15 = vcombine.low %v1522_v62, %v1526_v2  ;;  %v1578_v1 = vld [vmem:[#allocation6 + $0x7d8] sm:$0xff] }
 0x409   : > { %3153 = vmatpush1.bf16.msra.mxu1 %v4613_v16  ;;  %3072 = vmatprep.subr.bf16.mxu0 %v4620_v17  ;;  %v4676_v16 = vcombine.high %v1529_v6, %v1533_v25  ;;  %v4678_v17 = vcombine.high %v1530_v9, %v1534_v11  ;;  %v1582_v62 = vld [vmem:[#allocation6 + $0x7f8] sm:$0xff] }
 0x40a   : > { %3154 = vmatprep.subr.bf16.mxu1 %v4622_v20  ;;  %v1537_v20 = vld [vmem:[#allocation6 + $0x690] sm:$0xff]  ;;  %v4725_v6 = vcombine.low %v1578_v1, %v1582_v62 }
 0x40b   : > { %v4683_v35 = vcombine.low %v1537_v20, %v1541_v21 }
 0x40c   : > { %3073 = vmatpush1.bf16.msra.mxu0 %v4619_v27  ;;  %v4677_v27 = vcombine.low %v1530_v9, %v1534_v11 }
 0x40d   : > { %3155 = vmatpush1.bf16.msra.mxu1 %v4621_v26  ;;  %3074 = vmatprep.subr.bf16.mxu0 %v4628_v28  ;;  %v4684_v26 = vcombine.high %v1537_v20, %v1541_v21  ;;  %v4686_v28 = vcombine.high %v1538_v22, %v1542_v23 }
 0x40e   : > { %3156 = vmatprep.subr.bf16.mxu1 %v4630_v29  ;;  %v1545_v29 = vld [vmem:[#allocation6 + $0x6d0] sm:$0xff] }
 0x40f   : > { %v4691_v43 = vcombine.low %v1545_v29, %v1549_v31 }
 0x410   : > { %3075 = vmatpush1.bf16.msra.mxu0 %v4627_v36  ;;  %v4685_v36 = vcombine.low %v1538_v22, %v1542_v23 }
 0x411   : > { %3157 = vmatpush1.bf16.msra.mxu1 %v4629_v37  ;;  %3076 = vmatprep.subr.bf16.mxu0 %v4636_v30  ;;  %v4692_v37 = vcombine.high %v1545_v29, %v1549_v31  ;;  %v4694_v30 = vcombine.high %v1546_v32, %v1550_v34 }
 0x412   : > { %3158 = vmatprep.subr.bf16.mxu1 %v4638_v33  ;;  %v1553_v33 = vld [vmem:[#allocation6 + $0x710] sm:$0xff] }
 0x413   : > { %v4699_v45 = vcombine.low %v1553_v33, %v1557_v38 }
 0x414   : > { %3077 = vmatpush1.bf16.msra.mxu0 %v4635_v44  ;;  %v4693_v44 = vcombine.low %v1546_v32, %v1550_v34 }
 0x415   : > { %3159 = vmatpush1.bf16.msra.mxu1 %v4637_v50  ;;  %3078 = vmatprep.subr.bf16.mxu0 %v4644_v51  ;;  %v4700_v50 = vcombine.high %v1553_v33, %v1557_v38  ;;  %v4702_v51 = vcombine.high %v1554_v41, %v1558_v42 }
 0x416   : > { %3160 = vmatprep.subr.bf16.mxu1 %v4646_v52  ;;  %v1561_v52 = vld [vmem:[#allocation6 + $0x750] sm:$0xff] }
 0x417   : > { %v4707_v61 = vcombine.low %v1561_v52, %v1565_v54 }
 0x418   : > { %3079 = vmatpush1.bf16.msra.mxu0 %v4643_v47  ;;  %v4701_v47 = vcombine.low %v1554_v41, %v1558_v42 }
 0x419   : > { %3161 = vmatpush1.bf16.msra.mxu1 %v4645_v48  ;;  %3080 = vmatprep.subr.bf16.mxu0 %v4652_v49  ;;  %v4708_v48 = vcombine.high %v1561_v52, %v1565_v54  ;;  %v4710_v49 = vcombine.high %v1562_v55, %v1566_v56 }
 0x41a   : > { %3162 = vmatprep.subr.bf16.mxu1 %v4654_v53  ;;  %v1569_v53 = vld [vmem:[#allocation6 + $0x790] sm:$0xff] }
 0x41b   : > { %v4715_v2 = vcombine.low %v1569_v53, %v1573_v57 }
 0x41c   : > { %3081 = vmatpush1.bf16.msra.mxu0 %v4651_v63  ;;  %v4709_v63 = vcombine.low %v1562_v55, %v1566_v56 }
 0x41d   : > { %3163 = vmatpush1.bf16.msra.mxu1 %v4653_v3  ;;  %3082 = vmatprep.subr.bf16.mxu0 %v4660_v5  ;;  %v4716_v3 = vcombine.high %v1569_v53, %v1573_v57  ;;  %v4718_v5 = vcombine.high %v1570_v13, %v1574_v60 }
 0x41e   : > { %3164 = vmatprep.subr.bf16.mxu1 %v4662_v7  ;;  %v1577_v7 = vld [vmem:[#allocation6 + $0x7d0] sm:$0xff] }
 0x420   : > { %3083 = vmatpush1.bf16.msra.mxu0 %v4659_v0  ;;  %v4717_v0 = vcombine.low %v1570_v13, %v1574_v60 }
 0x421   : > { %3165 = vmatpush1.bf16.msra.mxu1 %v4661_v58  ;;  %3084 = vmatprep.subr.bf16.mxu0 %v4668_v59  ;;  %v4724_v58 = vcombine.high %v1577_v7, %v1581_v8  ;;  %v4726_v59 = vcombine.high %v1578_v1, %v1582_v62 }
 0x422   : > { %3166 = vmatprep.subr.bf16.mxu1 %v4670_v4  ;;  %v4723_v4 = vcombine.low %v1577_v7, %v1581_v8 }
 0x424   : > { %3085 = vmatpush1.bf16.msra.mxu0 %v4667_v14 }
 0x425   : > { %3167 = vmatpush1.bf16.msra.mxu1 %v4669_v15  ;;  %3086 = vmatprep.subr.bf16.mxu0 %v4676_v16 }
 0x426   : > { %3168 = vmatprep.subr.bf16.mxu1 %v4678_v17 }
 0x428   : > { %3087 = vmatpush1.bf16.msra.mxu0 %v4675_v24 }
 0x429   : > { %3169 = vmatpush1.bf16.msra.mxu1 %v4677_v27  ;;  %3088 = vmatprep.subr.bf16.mxu0 %v4684_v26 }
 0x42a   : > { %3170 = vmatprep.subr.bf16.mxu1 %v4686_v28 }
 0x42c   : > { %3089 = vmatpush1.bf16.msra.mxu0 %v4683_v35 }
 0x42d   : > { %3171 = vmatpush1.bf16.msra.mxu1 %v4685_v36  ;;  %3090 = vmatprep.subr.bf16.mxu0 %v4692_v37 }
 0x42e   : > { %3172 = vmatprep.subr.bf16.mxu1 %v4694_v30 }
 0x430   : > { %3091 = vmatpush1.bf16.msra.mxu0 %v4691_v43 }
 0x431   : > { %3173 = vmatpush1.bf16.msra.mxu1 %v4693_v44  ;;  %3092 = vmatprep.subr.bf16.mxu0 %v4700_v50 }
 0x432   : > { %3174 = vmatprep.subr.bf16.mxu1 %v4702_v51 }
 0x434   : > { %3093 = vmatpush1.bf16.msra.mxu0 %v4699_v45 }
 0x435   : > { %3175 = vmatpush1.bf16.msra.mxu1 %v4701_v47  ;;  %3094 = vmatprep.subr.bf16.mxu0 %v4708_v48 }
 0x436   : > { %3176 = vmatprep.subr.bf16.mxu1 %v4710_v49 }
 0x438   : > { %3095 = vmatpush1.bf16.msra.mxu0 %v4707_v61 }
 0x439   : > { %3177 = vmatpush1.bf16.msra.mxu1 %v4709_v63  ;;  %3096 = vmatprep.subr.bf16.mxu0 %v4716_v3 }
 0x43a   : > { %3178 = vmatprep.subr.bf16.mxu1 %v4718_v5 }
 0x43c   : > { %3097 = vmatpush1.bf16.msra.mxu0 %v4715_v2 }
 0x43d   : > { %3179 = vmatpush1.bf16.msra.mxu1 %v4717_v0  ;;  %3098 = vmatprep.subr.bf16.mxu0 %v4724_v58 }
 0x43e   : > { %3180 = vmatprep.subr.bf16.mxu1 %v4726_v59 }
 0x440   : > { %3099 = vmatpush1.bf16.msra.mxu0 %v4723_v4 }
 0x441   : > { %3181 = vmatpush1.bf16.msra.mxu1 %v4725_v6 }
 0x443   : > { %3101 = vmatmul.mubr.bf16.vlgmr.msra.gmra.mrb[12].mxu0 %v5636_v46 }
 0x444   : > { %3183 = vmatmul.mubr.bf16.vlgmr.msra.gmra.mrb[12].mxu1 %v5636_v46 }
 0x496   : > { %v5648_v25 = vpop.f32.mrb[8].mxu0  ;;  %v5650_v9 = vpop.f32.mrb[8].mxu1 }
 0x497   : > { %v3191_v11 = vrot.slane %v5648_v25, 4  ;;  %v3247_v14 = vmul.f32 %v5648_v25, %v5648_v25  ;;  %v3203_v15 = vrot.slane %v5650_v9, 4  ;;  %v3249_v16 = vmul.f32 %v5650_v9, %v5650_v9  ;;  %v5658_v17 = vpop.f32.mrb[9].mxu0  ;;  %v5660_v20 = vpop.f32.mrb[9].mxu1 }
 0x498   : > { %v3197_v46 = vrot.slane %v5658_v17, 4  ;;  %v3248_v21 = vmul.f32 %v5658_v17, %v5658_v17  ;;  %v3209_v22 = vrot.slane %v5660_v20, 4  ;;  %v3250_v23 = vmul.f32 %v5660_v20, %v5660_v20  ;;  %v2942_v24 = vpop.f32.mrb[10].mxu0  ;;  %v3024_v27 = vpop.f32.mrb[10].mxu1 }
 0x499   : > { %v3192_v26 = vadd.f32 %v3191_v11, %v5648_v25  ;;  %v3255_v28 = vrot.slane %v3247_v14, 4  ;;  %v3204_v29 = vadd.f32 %v3203_v15, %v5650_v9  ;;  %v3267_v31 = vrot.slane %v3249_v16, 4  ;;  %v2943_v32 = vpop.f32.mrb[11].mxu0  ;;  %v3025_v34 = vpop.f32.mrb[11].mxu1 }
 0x49a   : > { %v3198_v35 = vadd.f32 %v3197_v46, %v5658_v17  ;;  %v3261_v36 = vrot.slane %v3248_v21, 4  ;;  %v3210_v37 = vadd.f32 %v3209_v22, %v5660_v20  ;;  %v3273_v30 = vrot.slane %v3250_v23, 4 }
 0x49b   : > { %v3193_v33 = vrot.slane %v3192_v26, 2  ;;  %v3256_v38 = vadd.f32 %v3255_v28, %v3247_v14  ;;  %v3205_v41 = vrot.slane %v3204_v29, 2  ;;  %v3268_v42 = vadd.f32 %v3267_v31, %v3249_v16 }
 0x49c   : > { %v3199_v43 = vrot.slane %v3198_v35, 2  ;;  %v3262_v44 = vadd.f32 %v3261_v36, %v3248_v21  ;;  %v3211_v50 = vrot.slane %v3210_v37, 2  ;;  %v3274_v51 = vadd.f32 %v3273_v30, %v3250_v23 }
 0x49d   : > { %v3194_v52 = vadd.f32 %v3193_v33, %v3192_v26  ;;  %v3257_v54 = vrot.slane %v3256_v38, 2  ;;  %v3206_v55 = vadd.f32 %v3205_v41, %v3204_v29  ;;  %v3269_v56 = vrot.slane %v3268_v42, 2 }
 0x49e   : > { %v3200_v45 = vadd.f32 %v3199_v43, %v3198_v35  ;;  %v3263_v47 = vrot.slane %v3262_v44, 2  ;;  %v3212_v48 = vadd.f32 %v3211_v50, %v3210_v37  ;;  %v3275_v49 = vrot.slane %v3274_v51, 2 }
 0x49f   : > { %v3195_v53 = vrot.slane %v3194_v52, 1  ;;  %v3258_v57 = vadd.f32 %v3257_v54, %v3256_v38  ;;  %v3207_v13 = vrot.slane %v3206_v55, 1  ;;  %v3270_v60 = vadd.f32 %v3269_v56, %v3268_v42  ;;  %v5088_v56 = vld [vmem:[#allocation7 + $0x40] sm:$0xff]  }
 0x4a0   : > { %v3201_v61 = vrot.slane %v3200_v45, 1  ;;  %v3264_v63 = vadd.f32 %v3263_v47, %v3262_v44  ;;  %v3213_v3 = vrot.slane %v3212_v48, 1  ;;  %v3276_v5 = vadd.f32 %v3275_v49, %v3274_v51  ;;  %v5090_v47 = vld [vmem:[#allocation7] sm:$0xff]   ;;  %4796 = vmatprep.subr.bf16.mxu0 %v5088_v56  ;;  %v5092_v49 = vld [vmem:[#allocation7 + $0x48] sm:$0xff]  }
 0x4a1   : > { %v3196_v7 = vadd.f32 %v3195_v53, %v3194_v52  ;;  %v3259_v8 = vrot.slane %v3258_v57, 1  ;;  %v3208_v1 = vadd.f32 %v3207_v13, %v3206_v55  ;;  %v3271_v62 = vrot.slane %v3270_v60, 1  ;;  %4797 = vmatpush3.bf16.msra.mxu0 %v5090_v47  ;;  %v5093_v53 = vld [vmem:[#allocation7 + $0xc8] sm:$0xff]  }
 0x4a2   : > { %v3202_v2 = vadd.f32 %v3201_v61, %v3200_v45  ;;  %v3265_v0 = vrot.slane %v3264_v63, 1  ;;  %v3214_v58 = vadd.f32 %v3213_v3, %v3212_v48  ;;  %v3277_v59 = vrot.slane %v3276_v5, 1  ;;  %v5089_v45 = vld [vmem:[#allocation7 + $0xc0] sm:$0xff]   ;;  %v5095_v13 = vld [vmem:[#allocation7 + $0x88] sm:$0xff]   ;;  %4798 = vmatprep.subr.bf16.mxu0 %v5092_v49  ;;  %v5097_v61 = vld [vmem:[#allocation7 + $0xd0] sm:$0xff]  }
 0x4a3   : > { %v5672_v4 = vmul.f32 0.125, %v3196_v7  ;;  %v3260_v6 = vadd.f32 %v3259_v8, %v3258_v57  ;;  %v5674_v11 = vmul.f32 0.125, %v3208_v1  ;;  %v3272_v14 = vadd.f32 %v3271_v62, %v3270_v60  ;;  %v5091_v48 = vld [vmem:[#allocation7 + $0x80] sm:$0xff]   ;;  %4818 = vmatprep.subr.bf16.mxu1 %v5089_v45  ;;  %v5094_v57 = vld [vmem:[#allocation7 + $0x8] sm:$0xff]   ;;  %v5096_v60 = vld [vmem:[#allocation7 + $0x50] sm:$0xff]  }
 0x4a4   : > { %v5676_v15 = vmul.f32 0.125, %v3202_v2  ;;  %v3266_v16 = vadd.f32 %v3265_v0, %v3264_v63  ;;  %v5678_v46 = vmul.f32 0.125, %v3214_v58  ;;  %v3278_v21 = vadd.f32 %v3277_v59, %v3276_v5  ;;  %4819 = vmatpush3.bf16.msra.mxu1 %v5091_v48  ;;  %v5098_v63 = vld [vmem:[#allocation7 + $0x10] sm:$0xff]   ;;  %v5100_v5 = vld [vmem:[#allocation7 + $0x58] sm:$0xff]   ;;  %v5104_v62 = vld [vmem:[#allocation7 + $0x60] sm:$0xff]  }
 0x4a5   : > { %v3303_v22 = vmul.f32 0.125, %v3260_v6  ;;  %v3311_v23 = vmul.f32 %v5672_v4, %v5672_v4  ;;  %v3305_v24 = vmul.f32 0.125, %v3272_v14  ;;  %v3313_v27 = vmul.f32 %v5674_v11, %v5674_v11  ;;  %4820 = vmatprep.subr.bf16.mxu1 %v5093_v53  ;;  %4799 = vmatpush3.bf16.msra.mxu0 %v5094_v57  ;;  %v5099_v3 = vld [vmem:[#allocation7 + $0x90] sm:$0xff]   ;;  %v5101_v7 = vld [vmem:[#allocation7 + $0xd8] sm:$0xff]   ;;  %v5105_v2 = vld [vmem:[#allocation7 + $0xe0] sm:$0xff]  }
 0x4a6   : > { %v3304_v26 = vmul.f32 0.125, %v3266_v16  ;;  %v3312_v28 = vmul.f32 %v5676_v15, %v5676_v15  ;;  %v3306_v29 = vmul.f32 0.125, %v3278_v21  ;;  %v3314_v31 = vmul.f32 %v5678_v46, %v5678_v46  ;;  %4800 = vmatprep.subr.bf16.mxu0 %v5096_v60  ;;  %v5102_v8 = vld [vmem:[#allocation7 + $0x18] sm:$0xff]   ;;  %v5106_v0 = vld [vmem:[#allocation7 + $0x20] sm:$0xff]   ;;  %v5108_v59 = vld [vmem:[#allocation7 + $0x68] sm:$0xff]  }
 0x4a7   : > { %v3319_v32 = vsub.f32 %v3303_v22, %v3311_v23  ;;  %v3321_v34 = vsub.f32 %v3305_v24, %v3313_v27  ;;  %v5103_v1 = vld [vmem:[#allocation7 + $0x98] sm:$0xff]   ;;  %v5107_v58 = vld [vmem:[#allocation7 + $0xa0] sm:$0xff]   ;;  %v5109_v6 = vld [vmem:[#allocation7 + $0xe8] sm:$0xff]  }
 0x4a8   : > { %v3320_v35 = vsub.f32 %v3304_v26, %v3312_v28  ;;  %v3322_v36 = vsub.f32 %v3306_v29, %v3314_v31  ;;  %4821 = vmatpush3.bf16.msra.mxu1 %v5095_v13  ;;  %v5110_v14 = vld [vmem:[#allocation7 + $0x28] sm:$0xff]   ;;  %v5112_v21 = vld [vmem:[#allocation7 + $0x70] sm:$0xff]   ;;  %v5116_v27 = vld [vmem:[#allocation7 + $0x78] sm:$0xff]  }
 0x4a9   : > { %v3327_v37 = vadd.f32 0.8, %v3319_v32  ;;  %v3329_v30 = vadd.f32 0.8, %v3321_v34  ;;  %4822 = vmatprep.subr.bf16.mxu1 %v5097_v61  ;;  %4801 = vmatpush3.bf16.msra.mxu0 %v5098_v63  ;;  %v5111_v16 = vld [vmem:[#allocation7 + $0xa8] sm:$0xff]   ;;  %v5113_v22 = vld [vmem:[#allocation7 + $0xf0] sm:$0xff]  }
 0x4aa   : > { %v3328_v33 = vadd.f32 0.8, %v3320_v35  ;;  %v3330_v38 = vadd.f32 0.8, %v3322_v36  ;;  %4802 = vmatprep.subr.bf16.mxu0 %v5100_v5  ;;  %v5114_v23 = vld [vmem:[#allocation7 + $0x30] sm:$0xff]   ;;  %v5117_v26 = vld [vmem:[#allocation7 + $0xf8] sm:$0xff]  }
 0x4ab   : > { %5164 = vrsqrt.f32 %v3327_v37  ;;  %v5115_v24 = vld [vmem:[#allocation7 + $0xb0] sm:$0xff]   ;;  %v5118_v28 = vld [vmem:[#allocation7 + $0x38] sm:$0xff]   ;;  %v5120_v31 = vld [vmem:[#allocation7 + $0x140] sm:$0xff]  }
 0x4ac   : > { %5166 = vrsqrt.f32 %v3329_v30  ;;  %4823 = vmatpush3.bf16.msra.mxu1 %v5099_v3  ;;  %v5119_v29 = vld [vmem:[#allocation7 + $0xb8] sm:$0xff]   ;;  %v5121_v32 = vld [vmem:[#allocation7 + $0x1c0] sm:$0xff]  }
 0x4ad   : > { %5168 = vrsqrt.f32 %v3328_v33  ;;  %4824 = vmatprep.subr.bf16.mxu1 %v5101_v7  ;;  %4803 = vmatpush3.bf16.msra.mxu0 %v5102_v8 }
 0x4ae   : > { %5170 = vrsqrt.f32 %v3330_v38  ;;  %4804 = vmatprep.subr.bf16.mxu0 %v5104_v62 }
 0x4b0   : > { %4825 = vmatpush3.bf16.msra.mxu1 %v5103_v1 }
 0x4b1   : > { %4826 = vmatprep.subr.bf16.mxu1 %v5105_v2  ;;  %4805 = vmatpush3.bf16.msra.mxu0 %v5106_v0 }
 0x4b2   : > { %4806 = vmatprep.subr.bf16.mxu0 %v5108_v59 }
 0x4b4   : > { %4827 = vmatpush3.bf16.msra.mxu1 %v5107_v58 }
 0x4b5   : > { %v5165_v41 = vpop.eup %5164  ;;  %4828 = vmatprep.subr.bf16.mxu1 %v5109_v6  ;;  %4807 = vmatpush3.bf16.msra.mxu0 %v5110_v14 }
 0x4b6   : > { %v5167_v42 = vpop.eup %5166  ;;  %4808 = vmatprep.subr.bf16.mxu0 %v5112_v21 }
 0x4b7   : > { %v5169_v43 = vpop.eup %5168 }
 0x4b8   : > { %v5171_v44 = vpop.eup %5170  ;;  %v3351_v50 = vcombine.low %v5165_v41, %v5169_v43  ;;  %4829 = vmatpush3.bf16.msra.mxu1 %v5111_v16 }
 0x4b9   : > { %v3352_v51 = vcombine.low %v5167_v42, %v5171_v44  ;;  %4830 = vmatprep.subr.bf16.mxu1 %v5113_v22  ;;  %4809 = vmatpush3.bf16.msra.mxu0 %v5114_v23 }
 0x4ba   : > { %v5689_v52 = vrot.slane %v3351_v50, %v5521_v12  ;;  %4810 = vmatprep.subr.bf16.mxu0 %v5116_v27 }
 0x4bb   : > { %v5692_v54 = vrot.slane %v3352_v51, %v5521_v12 }
 0x4bc   : > { %4831 = vmatpush3.bf16.msra.mxu1 %v5115_v24 }
 0x4bd   : > { %v3383_v55 = vcombine.low %v5689_v52, %v5692_v54  ;;  %4832 = vmatprep.subr.bf16.mxu1 %v5117_v26  ;;  %4811 = vmatpush3.bf16.msra.mxu0 %v5118_v28 }
 0x4be   : > { %4840 = vmatprep.subr.bf16.mxu0 %v5120_v31 }
 0x4c0   : > { %4833 = vmatpush3.bf16.msra.mxu1 %v5119_v29 }
 0x4c1   : > { %4862 = vmatprep.subr.bf16.mxu1 %v5121_v32 }
 0x516   : > { %v5696_v34 = vpop.f32.mrb[12].mxu0 }
 0x517   : > { %v3215_v35 = vrot.slane %v5696_v34, 4  ;;  %v3251_v36 = vmul.f32 %v5696_v34, %v5696_v34  ;;  %v5701_v37 = vpop.f32.mrb[12].mxu1  ;;  %v5703_v30 = vpop.f32.mrb[13].mxu0 }
 0x518   : > { %v3227_v33 = vrot.slane %v5701_v37, 4  ;;  %v3253_v38 = vmul.f32 %v5701_v37, %v5701_v37  ;;  %v3221_v41 = vrot.slane %v5703_v30, 4  ;;  %v3252_v42 = vmul.f32 %v5703_v30, %v5703_v30  ;;  %v5711_v43 = vpop.f32.mrb[13].mxu1  ;;  %v3106_v44 = vpop.f32.mrb[14].mxu0 }
 0x519   : > { %v3216_v50 = vadd.f32 %v3215_v35, %v5696_v34  ;;  %v3279_v51 = vrot.slane %v3251_v36, 4  ;;  %v3233_v56 = vrot.slane %v5711_v43, 4  ;;  %v3254_v45 = vmul.f32 %v5711_v43, %v5711_v43  ;;  %v3188_v47 = vpop.f32.mrb[14].mxu1  ;;  %v3107_v48 = vpop.f32.mrb[15].mxu0 }
 0x51a   : > { %v3228_v49 = vadd.f32 %v3227_v33, %v5701_v37  ;;  %v3291_v53 = vrot.slane %v3253_v38, 4  ;;  %v3222_v57 = vadd.f32 %v3221_v41, %v5703_v30  ;;  %v3285_v13 = vrot.slane %v3252_v42, 4  ;;  %v3189_v60 = vpop.f32.mrb[15].mxu1 }
 0x51b   : > { %v3217_v61 = vrot.slane %v3216_v50, 2  ;;  %v3280_v63 = vadd.f32 %v3279_v51, %v3251_v36  ;;  %v3234_v3 = vadd.f32 %v3233_v56, %v5711_v43  ;;  %v3297_v5 = vrot.slane %v3254_v45, 4 }
 0x51c   : > { %v3229_v7 = vrot.slane %v3228_v49, 2  ;;  %v3292_v8 = vadd.f32 %v3291_v53, %v3253_v38  ;;  %v3223_v1 = vrot.slane %v3222_v57, 2  ;;  %v3286_v62 = vadd.f32 %v3285_v13, %v3252_v42 }
 0x51d   : > { %v3218_v2 = vadd.f32 %v3217_v61, %v3216_v50  ;;  %v3281_v0 = vrot.slane %v3280_v63, 2  ;;  %v3235_v58 = vrot.slane %v3234_v3, 2  ;;  %v3298_v59 = vadd.f32 %v3297_v5, %v3254_v45 }
 0x51e   : > { %v3230_v6 = vadd.f32 %v3229_v7, %v3228_v49  ;;  %v3293_v14 = vrot.slane %v3292_v8, 2  ;;  %v3224_v16 = vadd.f32 %v3223_v1, %v3222_v57  ;;  %v3287_v21 = vrot.slane %v3286_v62, 2 }
 0x51f   : > { %v3219_v22 = vrot.slane %v3218_v2, 1  ;;  %v3282_v23 = vadd.f32 %v3281_v0, %v3280_v63  ;;  %v3236_v24 = vadd.f32 %v3235_v58, %v3234_v3  ;;  %v3299_v27 = vrot.slane %v3298_v59, 2 }
 0x520   : > { %v3231_v26 = vrot.slane %v3230_v6, 1  ;;  %v3294_v28 = vadd.f32 %v3293_v14, %v3292_v8  ;;  %v3225_v29 = vrot.slane %v3224_v16, 1  ;;  %v3288_v31 = vadd.f32 %v3287_v21, %v3286_v62 }
 0x521   : > { %v3220_v32 = vadd.f32 %v3219_v22, %v3218_v2  ;;  %v3283_v35 = vrot.slane %v3282_v23, 1  ;;  %v3237_v36 = vrot.slane %v3236_v24, 1  ;;  %v3300_v33 = vadd.f32 %v3299_v27, %v3298_v59 }
 0x522   : > { %v3232_v38 = vadd.f32 %v3231_v26, %v3230_v6  ;;  %v3295_v41 = vrot.slane %v3294_v28, 1  ;;  %v3226_v42 = vadd.f32 %v3225_v29, %v3224_v16  ;;  %v3289_v44 = vrot.slane %v3288_v31, 1 }
 0x523   : > { %v3243_v50 = vmul.f32 0.125, %v3220_v32  ;;  %v3284_v51 = vadd.f32 %v3283_v35, %v3282_v23  ;;  %v3238_v56 = vadd.f32 %v3237_v36, %v3236_v24  ;;  %v3301_v45 = vrot.slane %v3300_v33, 1  ;;  %v339_v36 = vld [vmem:[%s5785_s1 + $0xd] sm:$0xff] }
 0x524   : > { %v3245_v47 = vmul.f32 0.125, %v3232_v38  ;;  %v3296_v48 = vadd.f32 %v3295_v41, %v3294_v28  ;;  %v3244_v49 = vmul.f32 0.125, %v3226_v42  ;;  %v3290_v53 = vadd.f32 %v3289_v44, %v3288_v31 }
 0x525   : > { %v3307_v57 = vmul.f32 0.125, %v3284_v51  ;;  %v3315_v13 = vmul.f32 %v3243_v50, %v3243_v50  ;;  %v3246_v60 = vmul.f32 0.125, %v3238_v56  ;;  %v3302_v61 = vadd.f32 %v3301_v45, %v3300_v33 }
 0x526   : > { %v3309_v63 = vmul.f32 0.125, %v3296_v48  ;;  %v3317_v3 = vmul.f32 %v3245_v47, %v3245_v47  ;;  %v3308_v5 = vmul.f32 0.125, %v3290_v53  ;;  %v3316_v7 = vmul.f32 %v3244_v49, %v3244_v49 }
 0x527   : > { %v3323_v8 = vsub.f32 %v3307_v57, %v3315_v13  ;;  %v3310_v1 = vmul.f32 0.125, %v3302_v61  ;;  %v3318_v62 = vmul.f32 %v3246_v60, %v3246_v60  ;;  %v3391_v32 = vrot.slane %v3383_v55, %v5521_v12 }
 0x528   : > { %v3325_v2 = vsub.f32 %v3309_v63, %v3317_v3  ;;  %v3324_v0 = vsub.f32 %v3308_v5, %v3316_v7  ;;  %v3421_v38 = vsub.s32 4, %v5518_v10  ;;  %v3425_v41 = vsub.s32 5, %v5518_v10 }
 0x529   : > { %v3331_v58 = vadd.f32 0.8, %v3323_v8  ;;  %v3326_v59 = vsub.f32 %v3310_v1, %v3318_v62  ;;  %v3429_v42 = vsub.s32 6, %v5518_v10  ;;  %v3433_v44 = vsub.s32 7, %v5518_v10 }
 0x52a   : > { %v3333_v6 = vadd.f32 0.8, %v3325_v2  ;;  %v3332_v14 = vadd.f32 0.8, %v3324_v0 }
 0x52b   : > { %5172 = vrsqrt.f32 %v3331_v58  ;;  %v3334_v16 = vadd.f32 0.8, %v3326_v59 }
 0x52c   : > { %5174 = vrsqrt.f32 %v3333_v6 }
 0x52d   : > { %5176 = vrsqrt.f32 %v3332_v14  ;;  %v340_v14 = vld [vmem:[%s5785_s1 + $0x15] sm:$0xff] }
 0x52e   : > { %5178 = vrsqrt.f32 %v3334_v16 }
 0x535   : > { %v5173_v21 = vpop.eup %5172 }
 0x536   : > { %v5175_v22 = vpop.eup %5174 }
 0x537   : > { %v5177_v23 = vpop.eup %5176 }
 0x538   : > { %v5179_v24 = vpop.eup %5178  ;;  %v3353_v27 = vcombine.low %v5173_v21, %v5177_v23 }
 0x539   : > { %v3354_v26 = vcombine.low %v5175_v22, %v5179_v24 }
 0x53a   : > { %v3375_v28 = vrot.slane %v3353_v27, %v5521_v12 }
 0x53b   : > { %v3382_v29 = vrot.slane %v3354_v26, %v5521_v12 }
 0x53d   : > { %v3384_v31 = vcombine.low %v3375_v28, %v3382_v29 }
 0x53f   : > { %v3398_v35 = vrot.slane %v3384_v31, %v5521_v12 }
 0x541   : > { %v3399_v33 = vcombine.low %v3391_v32, %v3398_v35 }
 0x543   : > { %v3401_v51 = vmul.f32 %v3399_v33, %v339_v36 }
 0x545   : > { %v3406_v56 = vrot.slane %v3401_v51, %v5529_v18  ;;  %v3410_v52 = vrot.slane %v3401_v51, %v5532_v19  ;;  %v3414_v54 = vrot.slane %v3401_v51, %v5590_v39  ;;  %v3418_v55 = vrot.slane %v3401_v51, %v5593_v40 }
 0x546   : > { %v3422_v45 = vrot.slane %v3401_v51, %v3421_v38  ;;  %v3426_v48 = vrot.slane %v3401_v51, %v3425_v41  ;;  %v3430_v53 = vrot.slane %v3401_v51, %v3429_v42  ;;  %v3434_v57 = vrot.slane %v3401_v51, %v3433_v44 }
 0x547   : > { %v3451_v13 = vmul.f32 %v3406_v56, %v5672_v4  ;;  %v3452_v61 = vmul.f32 %v3410_v52, %v5676_v15  ;;  %v3453_v63 = vmul.f32 %v3414_v54, %v5674_v11  ;;  %v3454_v10 = vmul.f32 %v3418_v55, %v5678_v46 }
 0x548   : > { %v3450_v3 = vmul.f32 %v3434_v57, %v5711_v43  ;;  %v3455_v5 = vmul.f32 %v3422_v45, %v3243_v50  ;;  %v3456_v7 = vmul.f32 %v3426_v48, %v3244_v49  ;;  %v3457_v8 = vmul.f32 %v3430_v53, %v3245_v47 }
 0x549   : > { %v3458_v1 = vmul.f32 %v3434_v57, %v3246_v60  ;;  %v3467_v62 = vcombine.low %v3451_v13, %v3452_v61  ;;  %v3468_v2 = vcombine.low %v3453_v63, %v3454_v10  ;;  %v3444_v0 = vmul.f32 %v3410_v52, %v5658_v17  ;;  %v5124_v57 = vld [vmem:[#allocation7 + $0x148] sm:$0xff]  }
 0x54a   : > { %v3469_v58 = vcombine.low %v3455_v5, %v3456_v7  ;;  %v3446_v59 = vmul.f32 %v3418_v55, %v5660_v20  ;;  %v3443_v4 = vmul.f32 %v3406_v56, %v5648_v25  ;;  %v3445_v15 = vmul.f32 %v3414_v54, %v5650_v9  ;;  %v5122_v54 = vld [vmem:[#allocation7 + $0x100] sm:$0xff]   ;;  %v5125_v61 = vld [vmem:[#allocation7 + $0x1c8] sm:$0xff]  }
 0x54b   : > { %v3470_v11 = vcombine.low %v3457_v8, %v3458_v1  ;;  %v3477_v46 = vrot.slane %v3467_v62, %v5521_v12  ;;  %v3484_v43 = vrot.slane %v3468_v2, %v5521_v12  ;;  %v3448_v50 = vmul.f32 %v3426_v48, %v5703_v30  ;;  %v5123_v55 = vld [vmem:[#allocation7 + $0x180] sm:$0xff]   ;;  %v5127_v5 = vld [vmem:[#allocation7 + $0x188] sm:$0xff]   ;;  %v5128_v8 = vld [vmem:[#allocation7 + $0x150] sm:$0xff]  }
 0x54c   : > { %v3491_v47 = vrot.slane %v3469_v58, %v5521_v12  ;;  %v3447_v49 = vmul.f32 %v3422_v45, %v5696_v34  ;;  %v3449_v17 = vmul.f32 %v3430_v53, %v5701_v37  ;;  %v5129_v1 = vld [vmem:[#allocation7 + $0x1d0] sm:$0xff]   ;;  %v5133_v58 = vld [vmem:[#allocation7 + $0x1d8] sm:$0xff]  }
 0x54d   : > { %v3498_v60 = vrot.slane %v3470_v11, %v5521_v12  ;;  %v3499_v20 = vcombine.low %v3477_v46, %v3484_v43  ;;  %v5130_v62 = vld [vmem:[#allocation7 + $0x110] sm:$0xff]   ;;  %v5137_v11 = vld [vmem:[#allocation7 + $0x1e0] sm:$0xff]  }
 0x54e   : > { %v5131_v2 = vld [vmem:[#allocation7 + $0x190] sm:$0xff]   ;;  %v5138_v46 = vld [vmem:[#allocation7 + $0x120] sm:$0xff]  }
 0x54f   : > { %v3500_v6 = vcombine.low %v3491_v47, %v3498_v60  ;;  %v3507_v25 = vrot.slane %v3499_v20, %v5521_v12  ;;  %v5139_v43 = vld [vmem:[#allocation7 + $0x1a0] sm:$0xff]   ;;  %v5141_v47 = vld [vmem:[#allocation7 + $0x1e8] sm:$0xff]   ;;  %v5144_v60 = vld [vmem:[#allocation7 + $0x170] sm:$0xff]  }
 0x550   : > { %v5145_v20 = vld [vmem:[#allocation7 + $0x1f0] sm:$0xff]  }
 0x551   : > { %v3514_v9 = vrot.slane %v3500_v6, %v5521_v12  ;;  %v5146_v6 = vld [vmem:[#allocation7 + $0x130] sm:$0xff]  }
 0x553   : > { %v3515_v16 = vcombine.low %v3507_v25, %v3514_v9  ;;  %v5147_v25 = vld [vmem:[#allocation7 + $0x1b0] sm:$0xff]   ;;  %v5148_v9 = vld [vmem:[#allocation7 + $0x178] sm:$0xff]  }
 0x555   : > { %v3517_v30 = vsub.f32 %v340_v14, %v3515_v16  ;;  %v5149_v14 = vld [vmem:[#allocation7 + $0x1f8] sm:$0xff]  }
 0x557   : > { %v3550_v21 = vrot.slane %v3517_v30, %v3433_v44  ;;  %v3526_v22 = vrot.slane %v3517_v30, %v5532_v19  ;;  %v3534_v34 = vrot.slane %v3517_v30, %v5593_v40  ;;  %v3522_v37 = vrot.slane %v3517_v30, %v5529_v18 }
 0x558   : > { %v3530_v23 = vrot.slane %v3517_v30, %v5590_v39  ;;  %v3542_v24 = vrot.slane %v3517_v30, %v3425_v41  ;;  %v3538_v27 = vrot.slane %v3517_v30, %v3421_v38  ;;  %v3546_v26 = vrot.slane %v3517_v30, %v3429_v42 }
 0x559   : > { %v3566_v28 = vadd.f32 %v3550_v21, %v3450_v3  ;;  %v3560_v12 = vadd.f32 %v3526_v22, %v3444_v0  ;;  %v3562_v29 = vadd.f32 %v3534_v34, %v3446_v59  ;;  %v3559_v31 = vadd.f32 %v3522_v37, %v3443_v4  ;;  %v5126_v3 = vld [vmem:[#allocation7 + $0x108] sm:$0xff]   ;;  %v5132_v0 = vld [vmem:[#allocation7 + $0x158] sm:$0xff]  }
 0x55a   : > { %v3561_v32 = vadd.f32 %v3530_v23, %v3445_v15  ;;  %v3564_v35 = vadd.f32 %v3542_v24, %v3448_v50  ;;  %v5763_v36 = vadd.f32 %v3538_v27, %v3447_v49  ;;  %v5765_v33 = vadd.f32 %v3546_v26, %v3449_v17  ;;  %v5134_v59 = vld [vmem:[#allocation7 + $0x118] sm:$0xff]   ;;  %v5136_v15 = vld [vmem:[#allocation7 + $0x160] sm:$0xff]   ;;  %v5140_v50 = vld [vmem:[#allocation7 + $0x168] sm:$0xff]  }
 0x55b   : > { %vm3568_vm9 = vcmp.gt.f32.partialorder %v3560_v12, 0.0  ;;  %v3576_v19 = vmul.f32 0.2, %v3560_v12  ;;  %vm3570_vm10 = vcmp.gt.f32.partialorder %v3562_v29, 0.0  ;;  %v3578_v40 = vmul.f32 0.2, %v3562_v29 }
 0x55c   : > { %vm3567_vm11 = vcmp.gt.f32.partialorder %v3559_v31, 0.0  ;;  %v3575_v18 = vmul.f32 0.2, %v3559_v31  ;;  %vm3569_vm12 = vcmp.gt.f32.partialorder %v3561_v32, 0.0  ;;  %v3577_v39 = vmul.f32 0.2, %v3561_v32 }
 0x55d   : > { %v3584_v38 = vsel %vm3568_vm9, %v3560_v12, %v3576_v19  ;;  %v3586_v41 = vsel %vm3570_vm10, %v3562_v29, %v3578_v40  ;;  %vm3572_vm13 = vcmp.gt.f32.partialorder %v3564_v35, 0.0  ;;  %v3580_v42 = vmul.f32 0.2, %v3564_v35  ;;  %v5135_v4 = vld [vmem:[#allocation7 + $0x198] sm:$0xff]   ;;  %v5142_v49 = vld [vmem:[#allocation7 + $0x128] sm:$0xff]  }
 0x55e   : > { %v3592_v44 = vpack.c.bf16 %v3584_v38, %v3584_v38  ;;  %v3594_v51 = vpack.c.bf16 %v3586_v41, %v3586_v41  ;;  %v3583_v56 = vsel %vm3567_vm11, %v3559_v31, %v3575_v18  ;;  %v3585_v52 = vsel %vm3569_vm12, %v3561_v32, %v3577_v39  ;;  %v5143_v17 = vld [vmem:[#allocation7 + $0x1a8] sm:$0xff]   ;;  %v5150_v21 = vld [vmem:[#allocation7 + $0x138] sm:$0xff]  }
 0x55f   : > { %v3591_v45 = vpack.c.bf16 %v3583_v56, %v3583_v56  ;;  %v3593_v48 = vpack.c.bf16 %v3585_v52, %v3585_v52  ;;  %v3588_v53 = vsel %vm3572_vm13, %v3564_v35, %v3580_v42  ;;  %vm3574_vm14 = vcmp.gt.f32.partialorder %v3566_v28, 0.0  ;;  %v5151_v22 = vld [vmem:[#allocation7 + $0x1b8] sm:$0xff]  }
 0x560   : > { %4149 = vmatprep.mubr.bf16.mxu0 %v3592_v44  ;;  %4189 = vmatprep.mubr.bf16.mxu1 %v3594_v51  ;;  %v3582_v13 = vmul.f32 0.2, %v3566_v28  ;;  %v3596_v63 = vpack.c.bf16 %v3588_v53, %v3588_v53  ;;  %v3579_v16 = vmul.f32 0.2, %v5763_v36  ;;  %v3581_v30 = vmul.f32 0.2, %v5765_v33 }
 0x561   : > { %4150 = vmatmul.mubr.bf16.vlgmr.msra.gmra.mrb[16].mxu0 %v3591_v45  ;;  %4190 = vmatmul.mubr.bf16.vlgmr.msra.gmra.mrb[16].mxu1 %v3593_v48  ;;  %vm3571_vm15 = vcmp.gt.f32.partialorder %v5763_v36, 0.0  ;;  %vm3573_vm0 = vcmp.gt.f32.partialorder %v5765_v33, 0.0 }
 0x562   : > { %4841 = vmatpush3.bf16.msra.mxu0 %v5122_v54  ;;  %4863 = vmatpush3.bf16.msra.mxu1 %v5123_v55  ;;  %v3590_v10 = vsel %vm3574_vm14, %v3566_v28, %v3582_v13  ;;  %v3587_v34 = vsel %vm3571_vm15, %v5763_v36, %v3579_v16  ;;  %v3589_v37 = vsel %vm3573_vm0, %v5765_v33, %v3581_v30  ;;  %v4727_v28 = vld [vmem:[%s5785_s1 + $0x1d] ss:$0 sm:$0xff] }
 0x563   : > { %4229 = vmatprep.mubr.bf16.mxu0 %v3596_v63  ;;  %v3598_v7 = vpack.c.bf16 %v3590_v10, %v3590_v10  ;;  %4842 = vmatprep.subr.bf16.mxu0 %v5124_v57  ;;  %v3595_v23 = vpack.c.bf16 %v3587_v34, %v3587_v34  ;;  %v3597_v24 = vpack.c.bf16 %v3589_v37, %v3589_v37 }
 0x564   : > { %4864 = vmatprep.subr.bf16.mxu1 %v5125_v61 }
 0x565   : > { %4269 = vmatprep.mubr.bf16.mxu1 %v3598_v7 }
 0x566   : > { %4843 = vmatpush3.bf16.msra.mxu0 %v5126_v3  ;;  %4865 = vmatpush3.bf16.msra.mxu1 %v5127_v5 }
 0x567   : > { %4844 = vmatprep.subr.bf16.mxu0 %v5128_v8  ;;  %4866 = vmatprep.subr.bf16.mxu1 %v5129_v1 }
 0x56a   : > { %4845 = vmatpush3.bf16.msra.mxu0 %v5130_v62  ;;  %4867 = vmatpush3.bf16.msra.mxu1 %v5131_v2 }
 0x56b   : > { %4846 = vmatprep.subr.bf16.mxu0 %v5132_v0  ;;  %4868 = vmatprep.subr.bf16.mxu1 %v5133_v58 }
 0x56e   : > { %4847 = vmatpush3.bf16.msra.mxu0 %v5134_v59  ;;  %4869 = vmatpush3.bf16.msra.mxu1 %v5135_v4 }
 0x56f   : > { %4848 = vmatprep.subr.bf16.mxu0 %v5136_v15  ;;  %4870 = vmatprep.subr.bf16.mxu1 %v5137_v11 }
 0x572   : > { %4849 = vmatpush3.bf16.msra.mxu0 %v5138_v46  ;;  %4871 = vmatpush3.bf16.msra.mxu1 %v5139_v43 }
 0x573   : > { %4850 = vmatprep.subr.bf16.mxu0 %v5140_v50  ;;  %4872 = vmatprep.subr.bf16.mxu1 %v5141_v47 }
 0x576   : > { %4851 = vmatpush3.bf16.msra.mxu0 %v5142_v49  ;;  %4873 = vmatpush3.bf16.msra.mxu1 %v5143_v17 }
 0x577   : > { %4852 = vmatprep.subr.bf16.mxu0 %v5144_v60  ;;  %4874 = vmatprep.subr.bf16.mxu1 %v5145_v20 }
 0x57a   : > { %4853 = vmatpush3.bf16.msra.mxu0 %v5146_v6  ;;  %4875 = vmatpush3.bf16.msra.mxu1 %v5147_v25 }
 0x57b   : > { %4854 = vmatprep.subr.bf16.mxu0 %v5148_v9  ;;  %4876 = vmatprep.subr.bf16.mxu1 %v5149_v14 }
 0x57e   : > { %4855 = vmatpush3.bf16.msra.mxu0 %v5150_v21  ;;  %4877 = vmatpush3.bf16.msra.mxu1 %v5151_v22 }
 0x581   : > { %4230 = vmatmul.mubr.bf16.vlgmr.msra.gmra.mrb[20].mxu0 %v3595_v23  ;;  %4270 = vmatmul.mubr.bf16.vlgmr.msra.gmra.mrb[20].mxu1 %v3597_v24 }
 0x634   : > { %v4812_v27 = vpop.f32.mrb[16].mxu0  ;;  %v4834_v26 = vpop.f32.mrb[16].mxu1 }
 0x635   : > { %v4813_v12 = vpop.f32.mrb[17].mxu0  ;;  %v4835_v29 = vpop.f32.mrb[17].mxu1 }
 0x636   : > { %v4814_v31 = vadd.f32 %v4813_v12, %v4812_v27  ;;  %v4836_v32 = vadd.f32 %v4835_v29, %v4834_v26  ;;  %v4815_v35 = vpop.f32.mrb[18].mxu0  ;;  %v4837_v36 = vpop.f32.mrb[18].mxu1 }
 0x637   : > { %v4816_v19 = vpop.f32.mrb[19].mxu0  ;;  %v4838_v33 = vpop.f32.mrb[19].mxu1 }
 0x638   : > { %v4152_v40 = vadd.f32 %v4814_v31, %v4727_v28 }
 0x63a   : > { %v4192_v18 = vadd.f32 %v4836_v32, %v4152_v40 }
 0x654   : > { %v4856_v39 = vpop.f32.mrb[20].mxu0  ;;  %v4878_v38 = vpop.f32.mrb[20].mxu1 }
 0x655   : > { %v4857_v41 = vpop.f32.mrb[21].mxu0  ;;  %v4879_v42 = vpop.f32.mrb[21].mxu1 }
 0x656   : > { %v4858_v44 = vadd.f32 %v4857_v41, %v4856_v39  ;;  %v4880_v51 = vadd.f32 %v4879_v42, %v4878_v38  ;;  %v4859_v56 = vpop.f32.mrb[22].mxu0  ;;  %v4881_v52 = vpop.f32.mrb[22].mxu1 }
 0x657   : > { %v4860_v54 = vpop.f32.mrb[23].mxu0  ;;  %v4882_v55 = vpop.f32.mrb[23].mxu1 }
 0x658   : > { %v4232_v45 = vadd.f32 %v4858_v44, %v4192_v18 }
 0x65a   : > { %v4272_v48 = vadd.f32 %v4880_v51, %v4232_v45 }
 0x65c   : > { %5180 = vtanh.f32 %v4272_v48 }
 0x666   : > { %v5181_v53 = vpop.eup %5180 }
 0x667   : > { %4278 = vst [vmem:[%s332_s12] sm:$0xff] %v5181_v53 }
 0x668 PF: > { %s20_s24 = sadd.s32 1, %s5312_s24  }
 0x669   : > { %p17_p1 = scmp.ge.s32.totalorder %s20_s24, 6  }
 0x66b   :  { %19 = sbr.rel (!%p17_p1) target bundleno = 3 (0x3), region = 95 }
 0x672   :  { %4298 = vsyncpa [#allocation3], 1 }
 0x673   :  { %4300 = vsyncpa [#allocation3 + $0x1], 1 }
 0x674   :  { %4301 = vsyncpa [#allocation5], 1 }
 0x675   :  { %4302 = vsyncpa [#allocation8], 1 }

</bundles_post_ra>
